<compile_context>
chip_gen: v7x
topology: tpu7x:2x2x1
jax: 0.10.0
libtpu: 0.0.40
codegen_flags: <defaults>
</compile_context>

<pallas_src>
import functools

import jax
import jax.numpy as jnp
from jax import lax
from jax.experimental import pallas as pl
from jax.experimental.pallas import tpu as pltpu


def _round_up(x, m):
    return ((x + m - 1) // m) * m


def _cdiv(a, b):
    return -(-a // b)


def _coattn_kernel(q_ref, v_ref, wvcat_ref, wq_ref, whq_ref, whv_ref, out_ref,
                   *, fq_pad, fv_pad, compute_dtype):
    # One batch-block (bb elements) per grid step.
    bb, lq, fq = q_ref.shape
    _, li, fv = v_ref.shape
    h = wq_ref.shape[1]
    cdt = compute_dtype

    # Single low-precision copies for the MXU; element-wise math stays f32.
    q_lp = q_ref[...].astype(cdt)                       # (bb, lq, fq)
    v_lp = v_ref[...].astype(cdt)                       # (bb, li, fv)

    # ---- weight-shared matmuls: fold batch into the MXU M dimension ----
    # Image side is fused: one pass over vf with RHS = [W_b^T | W_v^T].
    vf = v_lp.reshape(bb * li, fv)
    vcat = jnp.dot(vf, wvcat_ref[...],
                   preferred_element_type=jnp.float32)   # (bb*li, fq+h) f32
    img_corr = vcat[:, :fq].astype(cdt).reshape(bb, li, fq)
    v_emb = vcat[:, fq:].astype(cdt).reshape(bb, li, h)

    qf = q_lp.reshape(bb * lq, fq)
    q_emb = jnp.dot(qf, wq_ref[...],
                    preferred_element_type=jnp.float32
                    ).astype(cdt).reshape(bb, lq, h)

    # ---- affinity: tanh('bqf,bif->bqi'), contracting both LAST dims ----
    # (canonical TPU attention pattern; no explicit transpose / XLU vxpose)
    aff = jnp.tanh(lax.dot_general(
        q_lp, img_corr,
        dimension_numbers=(((2,), (2,)), ((0,), (0,))),
        preferred_element_type=jnp.float32)).astype(cdt)  # (bb, lq, li)

    # ---- question branch ----
    img_tr = lax.dot_general(                             # 'bqi,bih->bqh'
        aff, v_emb,
        dimension_numbers=(((2,), (1,)), ((0,), (0,))),
        preferred_element_type=jnp.float32)               # (bb, lq, h) f32
    q_hidden = jnp.tanh(img_tr + q_emb.astype(jnp.float32))
    whq = whq_ref[...].reshape(1, 1, h)                   # lane-dense row (VPU/XLU path)
    q_logits = jnp.sum(q_hidden * whq, axis=-1, keepdims=True)   # (bb, lq, 1)
    q_logits = q_logits - jnp.max(q_logits, axis=1, keepdims=True)
    q_exp = jnp.exp(q_logits)
    q_w = q_exp / jnp.sum(q_exp, axis=1, keepdims=True)   # exact softmax
    q_pool = jnp.sum(q_w * q_ref[...].astype(jnp.float32), axis=1)  # (bb, fq)

    # ---- image branch ----
    ques_tr = lax.dot_general(                            # 'bqi,bqh->bih'
        aff, q_emb,
        dimension_numbers=(((1,), (1,)), ((0,), (0,))),
        preferred_element_type=jnp.float32)               # (bb, li, h) f32
    v_hidden = jnp.tanh(ques_tr + v_emb.astype(jnp.float32))
    whv = whv_ref[...].reshape(1, 1, h)
    v_logits = jnp.sum(v_hidden * whv, axis=-1, keepdims=True)   # (bb, li, 1)
    v_logits = v_logits - jnp.max(v_logits, axis=1, keepdims=True)
    v_exp = jnp.exp(v_logits)
    v_w = v_exp / jnp.sum(v_exp, axis=1, keepdims=True)
    v_pool = jnp.sum(v_w * v_ref[...].astype(jnp.float32), axis=1)  # (bb, fv)

    # ---- packed, lane-dense output slab: [q_pool | 0pad | v_pool | 0pad] ----
    parts = [q_pool]
    if fq_pad > fq:
        parts.append(jnp.zeros((bb, fq_pad - fq), jnp.float32))
    parts.append(v_pool)
    if fv_pad > fv:
        parts.append(jnp.zeros((bb, fv_pad - fv), jnp.float32))
    out_ref[...] = jnp.concatenate(parts, axis=-1).astype(out_ref.dtype)


def _block_vmem_bytes(bb, lq, li, fq, fv, h, fq_pad, fv_pad, in_bytes, c_bytes):
    """Flat upper bound on VMEM for one grid step (pipeline buffers are
    double-buffered; in-kernel temporaries summed without reuse)."""
    buf = 2 * bb * (lq * fq + li * fv) * in_bytes               # q / v input blocks
    buf += 2 * bb * (fq_pad + fv_pad) * max(in_bytes, 4)        # packed output slab
    buf += 2 * (fv * (fq + h) + fq * h + 2 * h) * 4             # resident weights
    tmp = bb * (lq * fq + li * fv) * c_bytes                    # low-precision input copies
    tmp += bb * li * (fq + h) * 4                               # fused vf matmul result (f32)
    tmp += bb * (li * fq + (li + lq) * h) * c_bytes             # img_corr / v_emb / q_emb
    tmp += bb * lq * li * (4 + c_bytes)                         # affinity f32 tmp + lp copy
    tmp += 2 * bb * (lq + li) * h * 4                           # img_tr/ques_tr + hiddens
    tmp += bb * (lq * fq + li * fv) * 4                         # weighted-pooling products
    tmp += bb * (fq_pad + fv_pad) * 4                           # slab before store
    return buf + tmp


def _choose_block_b(B, lq, li, est, budget):
    """Batch-block size: a divisor of B (no batch padding) large enough to give
    the folded (bb*L, F) matmuls ~2 full MXU passes of row fill, capped by the
    VMEM budget, preferring >=2 grid steps (v7x has 2 TensorCores) when that
    does not tank MXU fill."""
    MXU_ROWS = 256                                   # v6e/v7x pass; v5e (128) subsumed
    want = max(1, _cdiv(2 * MXU_ROWS, max(min(lq, li), 1)))
    divisors = set()
    d = 1
    while d * d <= B:
        if B % d == 0:
            divisors.add(d)
            divisors.add(B // d)
        d += 1
    divisors = sorted(divisors)
    feasible = [x for x in divisors if est(x) <= budget] or [1]
    at_least = [x for x in feasible if x >= want]
    bb = at_least[0] if at_least else feasible[-1]
    if B // bb < 2:
        smaller = [x for x in feasible if x < bb and B // x >= 2]
        if smaller and smaller[-1] * min(lq, li) >= MXU_ROWS:
            bb = smaller[-1]
    return bb


@functools.partial(jax.jit, static_argnames=("block_b", "compute_dtype"))
def parallel_coattn(ques_feat, img_feat, W_b, W_q, W_v, W_hq, W_hv,
                    block_b=None, compute_dtype=jnp.bfloat16):
    """ques_feat: (B, Lq, Fq), img_feat: (B, Li, Fv). Weights in PyTorch
    nn.Linear layout (out_features, in_features); transposed/cast here (glue)."""
    B, Lq, Fq = ques_feat.shape
    _, Li, Fv = img_feat.shape
    H = W_q.shape[0]

    Fq_pad = _round_up(Fq, 128)          # lane-dense packed output slab
    Fv_pad = _round_up(Fv, 128)

    in_bytes = max(jnp.dtype(ques_feat.dtype).itemsize,
                   jnp.dtype(img_feat.dtype).itemsize)
    c_bytes = jnp.dtype(compute_dtype).itemsize

    # VMEM budget: query physical VMEM (v5e/v6e 128 MiB, v7x 64 MiB), raise the
    # scoped limit explicitly, and budget blocks at ~half of it (the per-block
    # estimate above is a conservative flat sum).
    try:
        phys_vmem = int(pltpu.get_tpu_info().vmem_capacity_bytes)
    except Exception:
        phys_vmem = 64 << 20             # conservative fallback (v7x physical)
    vmem_limit = phys_vmem * 3 // 4
    budget = vmem_limit // 2

    est = lambda bb: _block_vmem_bytes(bb, Lq, Li, Fq, Fv, H, Fq_pad, Fv_pad,
                                       in_bytes, c_bytes)
    if block_b is None:
        bb = _choose_block_b(B, Lq, Li, est, budget)
    else:
        bb = max(1, min(int(block_b), B))
        while B % bb != 0:               # snap to a divisor: no batch padding
            bb -= 1
    n_blocks = B // bb

    # Weights: nn.Linear (out,in) -> transposed RHS in the MXU dtype.
    # W_b and W_v share the vf LHS, so fuse them into one (Fv, Fq+H) RHS.
    wvcat = jnp.concatenate([W_b.T, W_v.T], axis=1).astype(compute_dtype)
    wq_t = W_q.T.astype(compute_dtype)                     # (Fq, H)
    whq_row = W_hq.astype(jnp.float32).reshape(1, H)       # lane-dense, VPU path
    whv_row = W_hv.astype(jnp.float32).reshape(1, H)

    slab_dtype = jnp.result_type(ques_feat.dtype, img_feat.dtype)
    rep = lambda b: (0, 0)                                 # weights: resident block

    kernel = functools.partial(_coattn_kernel, fq_pad=Fq_pad, fv_pad=Fv_pad,
                               compute_dtype=compute_dtype)

    slab = pl.pallas_call(
        kernel,
        out_shape=jax.ShapeDtypeStruct((B, Fq_pad + Fv_pad), slab_dtype),
        grid_spec=pltpu.PrefetchScalarGridSpec(
            num_scalar_prefetch=0,
            grid=(n_blocks,),
            in_specs=[
                pl.BlockSpec((bb, Lq, Fq), lambda b: (b, 0, 0)),
                pl.BlockSpec((bb, Li, Fv), lambda b: (b, 0, 0)),
                pl.BlockSpec((Fv, Fq + H), rep),
                pl.BlockSpec((Fq, H), rep),
                pl.BlockSpec((1, H), rep),
                pl.BlockSpec((1, H), rep),
            ],
            out_specs=pl.BlockSpec((bb, Fq_pad + Fv_pad), lambda b: (b, 0)),
        ),
        compiler_params=pltpu.CompilerParams(
            dimension_semantics=("parallel",),
            vmem_limit_bytes=int(vmem_limit)),
    )(ques_feat, img_feat, wvcat, wq_t, whq_row, whv_row)

    q_out = slab[:, :Fq].astype(ques_feat.dtype)
    v_out = slab[:, Fq_pad:Fq_pad + Fv].astype(img_feat.dtype)
    return q_out, v_out


def _reference(ques_feat, img_feat, W_b, W_q, W_v, W_hq, W_hv):
    # Pure-JAX f32 reference mirroring the PyTorch forward (inference mode).
    img_corr = jnp.einsum('bif,gf->big', img_feat, W_b)            # (B,Li,Fq)
    affinity = jnp.tanh(jnp.einsum('bqf,bif->bqi', ques_feat, img_corr))
    q_emb = jnp.einsum('bqf,hf->bqh', ques_feat, W_q)
    v_emb = jnp.einsum('bif,hf->bih', img_feat, W_v)
    img_tr = jnp.einsum('bqi,bih->bqh', affinity, v_emb)
    q_hid = jnp.tanh(img_tr + q_emb)
    q_w = jax.nn.softmax(jnp.einsum('bqh,oh->bqo', q_hid, W_hq)[..., 0], axis=1)
    q_out = jnp.einsum('bq,bqf->bf', q_w, ques_feat)
    ques_tr = jnp.einsum('bqi,bqh->bih', affinity, q_emb)
    v_hid = jnp.tanh(ques_tr + v_emb)
    v_w = jax.nn.softmax(jnp.einsum('bih,oh->bio', v_hid, W_hv)[..., 0], axis=1)
    v_out = jnp.einsum('bi,bif->bf', v_w, img_feat)
    return q_out, v_out


if __name__ == "__main__":
    # Small shapes consistent with the module:
    B, Lq, Li = 8, 8, 16           # batch, ques_seq_size, img_seq_size
    Fq, Fv, H = 32, 64, 32         # ques_feat_size, img_feat_size, num_hidden

    key = jax.random.PRNGKey(0)
    k1, k2, k3, k4, k5, k6, k7 = jax.random.split(key, 7)

    ques_feat = jax.random.normal(k1, (B, Lq, Fq), jnp.float32)
    img_feat = jax.random.normal(k2, (B, Li, Fv), jnp.float32)

    # Deterministic parameter init (nn.Linear weight layout: (out, in)).
    W_b = jax.random.normal(k3, (Fq, Fv), jnp.float32) * 0.1
    W_q = jax.random.normal(k4, (H, Fq), jnp.float32) * 0.1
    W_v = jax.random.normal(k5, (H, Fv), jnp.float32) * 0.1
    W_hq = jax.random.normal(k6, (1, H), jnp.float32) * 0.1
    W_hv = jax.random.normal(k7, (1, H), jnp.float32) * 0.1

    q_out, v_out = parallel_coattn(ques_feat, img_feat,
                                   W_b, W_q, W_v, W_hq, W_hv)
    jax.block_until_ready((q_out, v_out))

    q_ref, v_ref = _reference(ques_feat, img_feat, W_b, W_q, W_v, W_hq, W_hv)
    assert q_out.shape == (B, Fq) and v_out.shape == (B, Fv)
    assert q_out.dtype == ques_feat.dtype and v_out.dtype == img_feat.dtype
    # bf16 MXU operands with f32 accumulation -> relaxed (but tight) tolerance.
    assert jnp.allclose(q_out, q_ref, rtol=2e-2, atol=2e-2)
    assert jnp.allclose(v_out, v_ref, rtol=2e-2, atol=2e-2)

    print("KERNEL_OK")
</pallas_src>

<mosaic_0001>
module attributes {stable_mosaic.version = 11 : i64} {
  func.func @_coattn_kernel(%arg0: i32, %arg1: memref<8x8x32xf32, #tpu.memory_space<vmem>>, %arg2: memref<8x16x64xf32, #tpu.memory_space<vmem>>, %arg3: memref<64x64xbf16, #tpu.memory_space<vmem>>, %arg4: memref<32x32xbf16, #tpu.memory_space<vmem>>, %arg5: memref<1x32xf32, #tpu.memory_space<vmem>>, %arg6: memref<1x32xf32, #tpu.memory_space<vmem>>, %arg7: memref<8x256xf32, #tpu.memory_space<vmem>>) attributes {dimension_semantics = [#tpu.dimension_semantics<parallel>], iteration_bounds = array<i64: 1>, scalar_prefetch = 0 : i64, scratch_operands = 0 : i64, tpu.core_type = #tpu.core_type<tc>, window_params = [{transform_indices = @transform_0, window_bounds = array<i64: 8, 8, 32>}, {transform_indices = @transform_1, window_bounds = array<i64: 8, 16, 64>}, {pipeline_mode = #tpu.pipeline_mode<synchronous>, transform_indices = @transform_2, window_bounds = array<i64: 64, 64>}, {pipeline_mode = #tpu.pipeline_mode<synchronous>, transform_indices = @transform_3, window_bounds = array<i64: 32, 32>}, {pipeline_mode = #tpu.pipeline_mode<synchronous>, transform_indices = @transform_4, window_bounds = array<i64: 1, 32>}, {pipeline_mode = #tpu.pipeline_mode<synchronous>, transform_indices = @transform_5, window_bounds = array<i64: 1, 32>}, {transform_indices = @transform_6, window_bounds = array<i64: 8, 256>}]} {
    %c0 = arith.constant 0 : index
    %c0_0 = arith.constant 0 : index
    %c0_1 = arith.constant 0 : index
    %0 = vector.load %arg1[%c0, %c0_0, %c0_1] : memref<8x8x32xf32, #tpu.memory_space<vmem>>, vector<8x8x32xf32>
    %1 = arith.truncf %0 : vector<8x8x32xf32> to vector<8x8x32xbf16>
    %c0_2 = arith.constant 0 : index
    %c0_3 = arith.constant 0 : index
    %c0_4 = arith.constant 0 : index
    %2 = vector.load %arg2[%c0_2, %c0_3, %c0_4] : memref<8x16x64xf32, #tpu.memory_space<vmem>>, vector<8x16x64xf32>
    %3 = arith.truncf %2 : vector<8x16x64xf32> to vector<8x16x64xbf16>
    %4 = vector.shape_cast %3 : vector<8x16x64xbf16> to vector<128x64xbf16>
    %c0_5 = arith.constant 0 : index
    %c0_6 = arith.constant 0 : index
    %5 = vector.load %arg3[%c0_5, %c0_6] : memref<64x64xbf16, #tpu.memory_space<vmem>>, vector<64x64xbf16>
    %cst = arith.constant dense<0.000000e+00> : vector<128x64xf32>
    %6 = tpu.matmul %4, %5, %cst {dimension_numbers = #tpu.dot_dimension_numbers<[1], [0], [0], [1], [0, 0, 1, 1], [], []>} : vector<128x64xbf16>, vector<64x64xbf16>, vector<128x64xf32> -> vector<128x64xf32>
    %7 = vector.extract_strided_slice %6 {offsets = [0, 0], sizes = [128, 32], strides = [1, 1]} : vector<128x64xf32> to vector<128x32xf32>
    %8 = arith.truncf %7 : vector<128x32xf32> to vector<128x32xbf16>
    %9 = vector.shape_cast %8 : vector<128x32xbf16> to vector<8x16x32xbf16>
    %10 = vector.extract_strided_slice %6 {offsets = [0, 32], sizes = [128, 32], strides = [1, 1]} : vector<128x64xf32> to vector<128x32xf32>
    %11 = arith.truncf %10 : vector<128x32xf32> to vector<128x32xbf16>
    %12 = vector.shape_cast %11 : vector<128x32xbf16> to vector<8x16x32xbf16>
    %13 = vector.shape_cast %1 : vector<8x8x32xbf16> to vector<64x32xbf16>
    %c0_7 = arith.constant 0 : index
    %c0_8 = arith.constant 0 : index
    %14 = vector.load %arg4[%c0_7, %c0_8] : memref<32x32xbf16, #tpu.memory_space<vmem>>, vector<32x32xbf16>
    %cst_9 = arith.constant dense<0.000000e+00> : vector<64x32xf32>
    %15 = tpu.matmul %13, %14, %cst_9 {dimension_numbers = #tpu.dot_dimension_numbers<[1], [0], [0], [1], [0, 0, 1, 1], [], []>} : vector<64x32xbf16>, vector<32x32xbf16>, vector<64x32xf32> -> vector<64x32xf32>
    %16 = arith.truncf %15 : vector<64x32xf32> to vector<64x32xbf16>
    %17 = vector.shape_cast %16 : vector<64x32xbf16> to vector<8x8x32xbf16>
    %cst_10 = arith.constant dense<0.000000e+00> : vector<8x8x16xf32>
    %18 = tpu.matmul %1, %9, %cst_10 {dimension_numbers = #tpu.dot_dimension_numbers<[2], [2], [1], [1], [0, 0, 0, 1, 1, 1], [0], [0]>} : vector<8x8x32xbf16>, vector<8x16x32xbf16>, vector<8x8x16xf32> -> vector<8x8x16xf32>
    %19 = math.tanh %18 : vector<8x8x16xf32>
    %20 = arith.truncf %19 : vector<8x8x16xf32> to vector<8x8x16xbf16>
    %cst_11 = arith.constant dense<0.000000e+00> : vector<8x8x32xf32>
    %21 = tpu.matmul %20, %12, %cst_11 {dimension_numbers = #tpu.dot_dimension_numbers<[2], [1], [1], [2], [0, 0, 0, 1, 1, 2], [0], [0]>} : vector<8x8x16xbf16>, vector<8x16x32xbf16>, vector<8x8x32xf32> -> vector<8x8x32xf32>
    %22 = arith.extf %17 : vector<8x8x32xbf16> to vector<8x8x32xf32>
    %23 = arith.addf %21, %22 : vector<8x8x32xf32>
    %24 = math.tanh %23 : vector<8x8x32xf32>
    %c0_12 = arith.constant 0 : index
    %c0_13 = arith.constant 0 : index
    %25 = vector.load %arg5[%c0_12, %c0_13] : memref<1x32xf32, #tpu.memory_space<vmem>>, vector<1x32xf32>
    %26 = vector.shape_cast %25 : vector<1x32xf32> to vector<1x1x32xf32>
    %27 = vector.broadcast %26 : vector<1x1x32xf32> to vector<8x8x32xf32>
    %28 = arith.mulf %24, %27 : vector<8x8x32xf32>
    %cst_14 = arith.constant dense<0.000000e+00> : vector<8x8xf32>
    %29 = vector.multi_reduction <add>, %28, %cst_14 [2] : vector<8x8x32xf32> to vector<8x8xf32>
    %30 = vector.shape_cast %29 : vector<8x8xf32> to vector<8x8x1xf32>
    %cst_15 = arith.constant dense<0xFF800000> : vector<8x1xf32>
    %31 = vector.multi_reduction <maximumf>, %30, %cst_15 [1] : vector<8x8x1xf32> to vector<8x1xf32>
    %32 = vector.shape_cast %31 : vector<8x1xf32> to vector<8x1x1xf32>
    %33 = vector.broadcast %32 : vector<8x1x1xf32> to vector<8x8x1xf32>
    %34 = arith.subf %30, %33 : vector<8x8x1xf32>
    %35 = math.exp %34 : vector<8x8x1xf32>
    %cst_16 = arith.constant dense<0.000000e+00> : vector<8x1xf32>
    %36 = vector.multi_reduction <add>, %35, %cst_16 [1] : vector<8x8x1xf32> to vector<8x1xf32>
    %37 = vector.shape_cast %36 : vector<8x1xf32> to vector<8x1x1xf32>
    %38 = vector.broadcast %37 : vector<8x1x1xf32> to vector<8x8x1xf32>
    %39 = arith.divf %35, %38 : vector<8x8x1xf32>
    %c0_17 = arith.constant 0 : index
    %c0_18 = arith.constant 0 : index
    %c0_19 = arith.constant 0 : index
    %40 = vector.load %arg1[%c0_17, %c0_18, %c0_19] : memref<8x8x32xf32, #tpu.memory_space<vmem>>, vector<8x8x32xf32>
    %41 = vector.broadcast %39 : vector<8x8x1xf32> to vector<8x8x32xf32>
    %42 = arith.mulf %41, %40 : vector<8x8x32xf32>
    %cst_20 = arith.constant dense<0.000000e+00> : vector<8x32xf32>
    %43 = vector.multi_reduction <add>, %42, %cst_20 [1] : vector<8x8x32xf32> to vector<8x32xf32>
    %cst_21 = arith.constant dense<0.000000e+00> : vector<8x16x32xf32>
    %44 = tpu.matmul %20, %17, %cst_21 {dimension_numbers = #tpu.dot_dimension_numbers<[1], [1], [2], [2], [0, 0, 0, 2, 1, 2], [0], [0]>} : vector<8x8x16xbf16>, vector<8x8x32xbf16>, vector<8x16x32xf32> -> vector<8x16x32xf32>
    %45 = arith.extf %12 : vector<8x16x32xbf16> to vector<8x16x32xf32>
    %46 = arith.addf %44, %45 : vector<8x16x32xf32>
    %47 = math.tanh %46 : vector<8x16x32xf32>
    %c0_22 = arith.constant 0 : index
    %c0_23 = arith.constant 0 : index
    %48 = vector.load %arg6[%c0_22, %c0_23] : memref<1x32xf32, #tpu.memory_space<vmem>>, vector<1x32xf32>
    %49 = vector.shape_cast %48 : vector<1x32xf32> to vector<1x1x32xf32>
    %50 = vector.broadcast %49 : vector<1x1x32xf32> to vector<8x16x32xf32>
    %51 = arith.mulf %47, %50 : vector<8x16x32xf32>
    %cst_24 = arith.constant dense<0.000000e+00> : vector<8x16xf32>
    %52 = vector.multi_reduction <add>, %51, %cst_24 [2] : vector<8x16x32xf32> to vector<8x16xf32>
    %53 = vector.shape_cast %52 : vector<8x16xf32> to vector<8x16x1xf32>
    %cst_25 = arith.constant dense<0xFF800000> : vector<8x1xf32>
    %54 = vector.multi_reduction <maximumf>, %53, %cst_25 [1] : vector<8x16x1xf32> to vector<8x1xf32>
    %55 = vector.shape_cast %54 : vector<8x1xf32> to vector<8x1x1xf32>
    %56 = vector.broadcast %55 : vector<8x1x1xf32> to vector<8x16x1xf32>
    %57 = arith.subf %53, %56 : vector<8x16x1xf32>
    %58 = math.exp %57 : vector<8x16x1xf32>
    %cst_26 = arith.constant dense<0.000000e+00> : vector<8x1xf32>
    %59 = vector.multi_reduction <add>, %58, %cst_26 [1] : vector<8x16x1xf32> to vector<8x1xf32>
    %60 = vector.shape_cast %59 : vector<8x1xf32> to vector<8x1x1xf32>
    %61 = vector.broadcast %60 : vector<8x1x1xf32> to vector<8x16x1xf32>
    %62 = arith.divf %58, %61 : vector<8x16x1xf32>
    %c0_27 = arith.constant 0 : index
    %c0_28 = arith.constant 0 : index
    %c0_29 = arith.constant 0 : index
    %63 = vector.load %arg2[%c0_27, %c0_28, %c0_29] : memref<8x16x64xf32, #tpu.memory_space<vmem>>, vector<8x16x64xf32>
    %64 = vector.broadcast %62 : vector<8x16x1xf32> to vector<8x16x64xf32>
    %65 = arith.mulf %64, %63 : vector<8x16x64xf32>
    %cst_30 = arith.constant dense<0.000000e+00> : vector<8x64xf32>
    %66 = vector.multi_reduction <add>, %65, %cst_30 [1] : vector<8x16x64xf32> to vector<8x64xf32>
    %cst_31 = arith.constant 0.000000e+00 : f32
    %67 = vector.broadcast %cst_31 : f32 to vector<8x96xf32>
    %cst_32 = arith.constant 0.000000e+00 : f32
    %68 = vector.broadcast %cst_32 : f32 to vector<8x64xf32>
    %69 = tpu.concatenate %43, %67, %66, %68 in 1 : vector<8x32xf32>, vector<8x96xf32>, vector<8x64xf32>, vector<8x64xf32> -> vector<8x256xf32>
    %c0_33 = arith.constant 0 : index
    %c0_34 = arith.constant 0 : index
    %70 = vector.load %arg7[%c0_33, %c0_34] : memref<8x256xf32, #tpu.memory_space<vmem>>, vector<8x256xf32>
    tpu.vector_store %arg7[%c0_33, %c0_34], %69 {strides = array<i32>} : memref<8x256xf32, #tpu.memory_space<vmem>>, vector<8x256xf32>,
    return
  }
  func.func @transform_0(%arg0: i32) -> (i32, i32, i32) {
    %c0_i32 = arith.constant 0 : i32
    %c0_i32_0 = arith.constant 0 : i32
    %c0_i32_1 = arith.constant 0 : i32
    return %arg0, %c0_i32, %c0_i32_0 : i32, i32, i32
  }
  func.func @transform_1(%arg0: i32) -> (i32, i32, i32) {
    %c0_i32 = arith.constant 0 : i32
    %c0_i32_0 = arith.constant 0 : i32
    %c0_i32_1 = arith.constant 0 : i32
    return %arg0, %c0_i32, %c0_i32_0 : i32, i32, i32
  }
  func.func @transform_2(%arg0: i32) -> (i32, i32) {
    %c0_i32 = arith.constant 0 : i32
    %c0_i32_0 = arith.constant 0 : i32
    %c0_i32_1 = arith.constant 0 : i32
    return %c0_i32, %c0_i32_0 : i32, i32
  }
  func.func @transform_3(%arg0: i32) -> (i32, i32) {
    %c0_i32 = arith.constant 0 : i32
    %c0_i32_0 = arith.constant 0 : i32
    %c0_i32_1 = arith.constant 0 : i32
    return %c0_i32, %c0_i32_0 : i32, i32
  }
  func.func @transform_4(%arg0: i32) -> (i32, i32) {
    %c0_i32 = arith.constant 0 : i32
    %c0_i32_0 = arith.constant 0 : i32
    %c0_i32_1 = arith.constant 0 : i32
    return %c0_i32, %c0_i32_0 : i32, i32
  }
  func.func @transform_5(%arg0: i32) -> (i32, i32) {
    %c0_i32 = arith.constant 0 : i32
    %c0_i32_0 = arith.constant 0 : i32
    %c0_i32_1 = arith.constant 0 : i32
    return %c0_i32, %c0_i32_0 : i32, i32
  }
  func.func @transform_6(%arg0: i32) -> (i32, i32) {
    %c0_i32 = arith.constant 0 : i32
    %c0_i32_0 = arith.constant 0 : i32
    return %arg0, %c0_i32 : i32, i32
  }
}

</mosaic_0001>

<bundles_post_ra>
// kernel: parallel_coattn.1
= control target key start
LH: loop header
LB: loop body
LE: loop exit
PB: predicated region body
PF: predicated region fallthrough
CT: control target
= control target key end

     0   :  { %vm96_vm0 = vcmask 523264   ;;  %vm262_vm1 = vcmask 261120   ;;  %v2928_v42 = vmov 0.0   ;;  %vm2929_vm2 = vmmov 0   ;;  %s2930_s29 = smov 96   ;;  %s3668_s2 = inlined_call_operand.vmem [shape: bf16[64,64], index: 2, kind: input, shape index: {}]   ;;  %s3669_s1 = inlined_call_operand.vmem [shape: f32[8,16,64], index: 1, kind: input, shape index: {}]   ;;  %s3670_s3 = inlined_call_operand.vmem [shape: bf16[32,32], index: 3, kind: input, shape index: {}]   ;;  %s3671_s0 = inlined_call_operand.vmem [shape: f32[8,8,32], index: 0, kind: input, shape index: {}]   ;;  %s3672_s4 = inlined_call_operand.vmem [shape: f32[1,32], index: 4, kind: input, shape index: {}]   ;;  %s3673_s5 = inlined_call_operand.vmem [shape: f32[1,32], index: 5, kind: input, shape index: {}]   ;;  %s3674_s6 = inlined_call_operand.vmem [shape: f32[8,256], index: 6, kind: output, shape index: {}]  }
   0x1   :  { %v2738_v0 = vld [vmem:[%s3668_s2] sm:$0xff]   ;;  %v2739_v1 = vld [vmem:[%s3668_s2 + $0x8] sm:$0xff]   ;;  %v2740_v2 = vld [vmem:[%s3668_s2 + $0x10] sm:$0xff]   ;;  %vm768_vm3 = vcmask 130048   ;;  %vm1432_vm4 = vcmask 1043456   ;;  %vm1428_vm5 = vcmask 64512  }
   0x2   :  { %2514 = vmatprep.subr.bf16.mxu0 %v2738_v0  ;;  %v40_v3 = vld [vmem:[%s3669_s1] sm:$0xff]  ;;  %v41_v4 = vld [vmem:[%s3669_s1 + $0x8] sm:$0xff]  ;;  %v2741_v6 = vld [vmem:[%s3668_s2 + $0x18] sm:$0xff]   ;;  %vm2341_vm6 = vcmask 1041409   ;;  %vm2343_vm7 = vcmask 1042434   ;;  %vm2345_vm8 = vcmask 1043459  }
   0x3   :  { %2515 = vmatpush3.bf16.msra.mxu0 %v2738_v0  ;;  %v56_v5 = vpack.c.bf16 %v41_v4, %v40_v3  ;;  %v42_v7 = vld [vmem:[%s3669_s1 + $0x10] sm:$0xff]  ;;  %v43_v8 = vld [vmem:[%s3669_s1 + $0x18] sm:$0xff]  ;;  %v2742_v9 = vld [vmem:[%s3670_s3] sm:$0xff]   ;;  %vm2347_vm9 = vcmask 1044484   ;;  %vm2349_vm10 = vcmask 1045509   ;;  %vm2351_vm11 = vcmask 1046534  }
   0x4   :  { %2516 = vmatprep.subr.bf16.mxu0 %v2739_v1  ;;  %v2743_v10 = vld [vmem:[%s3670_s3 + $0x8] sm:$0xff]   ;;  %v3000_v11 = vld [vmem:[%s3671_s0] sm:$0xff]  ;;  %2538 = vmatprep.subr.bf16.mxu1 %v2742_v9  ;;  %v3018_v16 = vld [vmem:[%s3671_s0 + $0x10] sm:$0xff]  ;;  %v57_v18 = vpack.c.bf16 %v43_v8, %v42_v7  ;;  %vm2353_vm12 = vcmask 1047559  }
   0x5   :  { %2522 = vmatprep.mubr.msk.bf16.mxu0 %vm96_vm0, %v56_v5  ;;  %v3005_v12 = vld [vmem:[%s3671_s0 + $0x8] sm:$0xff]  ;;  %v44_v13 = vld [vmem:[%s3669_s1 + $0x20] sm:$0xff]  ;;  %2539 = vmatpush3.bf16.msra.mxu1 %v2742_v9  ;;  %v3023_v17 = vld [vmem:[%s3671_s0 + $0x18] sm:$0xff]  ;;  %v32_v53 = vpack.c.bf16 %v3000_v11, %v3000_v11 }
   0x6   :  { %v45_v14 = vld [vmem:[%s3669_s1 + $0x28] sm:$0xff]  ;;  %v2436_v15 = vpack.c.bf16 %v3005_v12, %v3000_v11  ;;  %2540 = vmatprep.subr.bf16.mxu1 %v2743_v10  ;;  %v2437_v20 = vpack.c.bf16 %v3023_v17, %v3018_v16  ;;  %v46_v21 = vld [vmem:[%s3669_s1 + $0x30] sm:$0xff]  ;;  %v47_v22 = vld [vmem:[%s3669_s1 + $0x38] sm:$0xff]  ;;  %v35_v60 = vpack.c.bf16 %v3023_v17, %v3023_v17 }
   0x7   :  { %2517 = vmatpush3.bf16.msra.mxu0 %v2739_v1  ;;  %v58_v19 = vpack.c.bf16 %v45_v14, %v44_v13  ;;  %v48_v23 = vld [vmem:[%s3669_s1 + $0x40] sm:$0xff]  ;;  %v49_v24 = vld [vmem:[%s3669_s1 + $0x48] sm:$0xff]  ;;  %v59_v25 = vpack.c.bf16 %v47_v22, %v46_v21  ;;  %v50_v27 = vld [vmem:[%s3669_s1 + $0x50] sm:$0xff]  ;;  %v33_v1 = vpack.c.bf16 %v3005_v12, %v3005_v12  ;;  %v34_v13 = vpack.c.bf16 %v3018_v16, %v3018_v16 }
   0x8   :  { %2518 = vmatprep.subr.bf16.mxu0 %v2740_v2  ;;  %2542 = vmatprep.mubr.msk.bf16.mxu1 %vm262_vm1, %v2436_v15  ;;  %v60_v26 = vpack.c.bf16 %v49_v24, %v48_v23  ;;  %v51_v28 = vld [vmem:[%s3669_s1 + $0x58] sm:$0xff]  ;;  %v52_v29 = vld [vmem:[%s3669_s1 + $0x60] sm:$0xff]  ;;  %v53_v30 = vld [vmem:[%s3669_s1 + $0x68] sm:$0xff] }
   0x9   :  { %2541 = vmatpush3.bf16.msra.mxu1 %v2743_v10  ;;  %v61_v31 = vpack.c.bf16 %v51_v28, %v50_v27  ;;  %v62_v32 = vpack.c.bf16 %v53_v30, %v52_v29  ;;  %v54_v33 = vld [vmem:[%s3669_s1 + $0x70] sm:$0xff]  ;;  %v55_v34 = vld [vmem:[%s3669_s1 + $0x78] sm:$0xff]  ;;  %v3069_v36 = vld [vmem:[%s3671_s0 + $0x20] sm:$0xff] }
   0xa   :  { %v63_v35 = vpack.c.bf16 %v55_v34, %v54_v33  ;;  %v3074_v37 = vld [vmem:[%s3671_s0 + $0x28] sm:$0xff]  ;;  %v3081_v39 = vld [vmem:[%s3671_s0 + $0x30] sm:$0xff]  ;;  %v3086_v40 = vld [vmem:[%s3671_s0 + $0x38] sm:$0xff]  ;;  %2550 = vmatprep.subr.bf16.mxu1 %v2928_v42 }
   0xb   :  { %2519 = vmatpush3.bf16.msra.mxu0 %v2740_v2  ;;  %v2438_v38 = vpack.c.bf16 %v3074_v37, %v3069_v36  ;;  %v2439_v41 = vpack.c.bf16 %v3086_v40, %v3081_v39  ;;  %v37_v11 = vpack.c.bf16 %v3074_v37, %v3074_v37  ;;  %v38_v22 = vpack.c.bf16 %v3081_v39, %v3081_v39 }
   0xc   :  { %2520 = vmatprep.subr.bf16.mxu0 %v2741_v6  ;;  %2543 = vmatmul.mubr.msk.bf16.vlgmr.msra.gmra.mrb[0].mxu1 %vm262_vm1, %v2437_v20  ;;  %v36_v20 = vpack.c.bf16 %v3069_v36, %v3069_v36 }
   0xd   :  { %2546 = vmatprep.mubr.msk.bf16.mxu1 %vm262_vm1, %v2438_v38 }
   0xf   :  { %2521 = vmatpush3.bf16.msra.mxu0 %v2741_v6 }
  0x10   :  { %2568 = vmatprep.subr.bf16.mxu0 %v2928_v42 }
  0x12   :  { %2523 = vmatmul.mubr.msk.bf16.vlgmr.msra.gmra.mrb[0].mxu0 %vm96_vm0, %v57_v18 }
  0x13   :  { %2526 = vmatprep.mubr.msk.bf16.mxu0 %vm96_vm0, %v58_v19  ;;  %v39_v19 = vpack.c.bf16 %v3086_v40, %v3086_v40 }
  0x14   :  { %2547 = vmatmul.mubr.msk.bf16.gmra.mrb[4].mxu1 %vm262_vm1, %v2439_v41 }
  0x15   :  { %2552 = vmatprep.mubr.msk.bf16.mxu1 %vm2929_vm2, %v2928_v42 }
  0x1a   :  { %2527 = vmatmul.mubr.msk.bf16.gmra.mrb[4].mxu0 %vm96_vm0, %v59_v25 }
  0x1b   :  { %2530 = vmatprep.mubr.msk.bf16.mxu0 %vm96_vm0, %v60_v26 }
  0x22   :  { %2531 = vmatmul.mubr.msk.bf16.gmra.mrb[8].mxu0 %vm96_vm0, %v61_v31 }
  0x23   :  { %2534 = vmatprep.mubr.msk.bf16.mxu0 %vm96_vm0, %v62_v32 }
  0x2a   :  { %2535 = vmatmul.mubr.msk.bf16.gmra.mrb[12].mxu0 %vm96_vm0, %v63_v35 }
  0x2b   :  { %2570 = vmatprep.mubr.msk.bf16.mxu0 %vm2929_vm2, %v2928_v42 }
  0xdf   :  { %v3142_v62 = vpop.f32.mrb[0].mxu1 }
  0xe0   :  { %v3147_v0 = vpop.f32.mrb[1].mxu1 }
  0xe1   :  { %v3155_v4 = vpop.f32.mrb[2].mxu1 }
  0xe2   :  { %v3159_v6 = vpop.f32.mrb[3].mxu1 }
  0xe5   :  { %v3098_v43 = vpop.f32.mrb[0].mxu0 }
  0xe6   :  { %v3100_v44 = vpop.f32.mrb[1].mxu0 }
  0xe7   :  { %v3102_v45 = vpop.f32.mrb[2].mxu0  ;;  %v3218_v23 = vpop.f32.mrb[4].mxu1 }
  0xe8   :  { %v219_v46 = vpack.c.bf16 %v3102_v45, %v3098_v43  ;;  %v3106_v47 = vpop.f32.mrb[3].mxu0  ;;  %v3220_v24 = vpop.f32.mrb[5].mxu1 }
  0xe9   :  { %v218_v48 = vpack.c.bf16 %v3106_v47, %v3100_v44  ;;  %v3222_v25 = vpop.f32.mrb[6].mxu1 }
  0xea   :  { %v422_v58 = vsel %vm262_vm1, %v219_v46, 0  ;;  %v3224_v26 = vpop.f32.mrb[7].mxu1 }
  0xeb   :  { %765 = vrot.lane.b32.xlu0 %v218_v48, %s2930_s29  ;;  %v376_v49 = vsel %vm262_vm1, %v218_v48, 0 }
  0xec   :  { %2551 = vmatpush3.bf16.xpose.msra.mxu1 %v376_v49 }
  0xed   :  { %v3112_v50 = vpop.f32.mrb[4].mxu0  ;;  %2556 = vmatprep.subr.bf16.mxu1 %v2928_v42 }
  0xee   :  { %v3115_v51 = vpop.f32.mrb[5].mxu0 }
  0xef   :  { %813 = vrot.lane.b32.xlu0 %v219_v46, %s2930_s29  ;;  %v3118_v52 = vpop.f32.mrb[6].mxu0 }
  0xf0   :  { %v221_v54 = vpack.c.bf16 %v3118_v52, %v3112_v50  ;;  %v3124_v55 = vpop.f32.mrb[7].mxu0 }
  0xf1   :  { %v220_v56 = vpack.c.bf16 %v3124_v55, %v3115_v51 }
  0xf2   :  { %v514_v57 = vsel %vm262_vm1, %v221_v54, 0 }
  0xf3   :  { %2569 = vmatpush3.bf16.xpose.msra.mxu0 %v514_v57  ;;  %860 = vrot.lane.b32.xlu1 %v220_v56, %s2930_s29  ;;  %v468_v8 = vsel %vm262_vm1, %v220_v56, 0 }
  0xf4   :  { %2553 = vmatmul.mubr.msk.bf16.vlgmr.msra.gmra.mrb[8].mxu1 %vm262_vm1, %v32_v53  ;;  %2580 = vmatprep.subr.bf16.mxu0 %v2928_v42 }
  0xf5   :  { %2557 = vmatpush3.bf16.xpose.msra.mxu1 %v422_v58  ;;  %v3133_v59 = vpop.f32.mrb[8].mxu0  ;;  %2558 = vmatprep.mubr.msk.bf16.mxu1 %vm2929_vm2, %v2928_v42 }
  0xf6   :  { %v3139_v61 = vpop.f32.mrb[9].mxu0  ;;  %2562 = vmatprep.subr.bf16.mxu1 %v2928_v42 }
  0xf7   :  { %907 = vrot.lane.b32.xlu1 %v221_v54, %s2930_s29  ;;  %v3145_v63 = vpop.f32.mrb[10].mxu0 }
  0xf8   :  { %v223_v2 = vpack.c.bf16 %v3145_v63, %v3133_v59  ;;  %v3153_v3 = vpop.f32.mrb[11].mxu0 }
  0xf9   :  { %v222_v5 = vpack.c.bf16 %v3153_v3, %v3139_v61 }
  0xfa   :  { %2571 = vmatmul.mubr.msk.bf16.vlgmr.msra.gmra.mrb[16].mxu0 %vm262_vm1, %v35_v60  ;;  %v606_v7 = vsel %vm262_vm1, %v223_v2, 0 }
  0xfb   :  { %2581 = vmatpush3.bf16.xpose.msra.mxu0 %v606_v7  ;;  %2582 = vmatprep.mubr.msk.bf16.mxu0 %vm2929_vm2, %v2928_v42  ;;  %v560_v16 = vsel %vm262_vm1, %v222_v5, 0 }
  0xfc   :  { %2559 = vmatmul.mubr.msk.bf16.vlgmr.msra.gmra.mrb[12].mxu1 %vm262_vm1, %v33_v1  ;;  %2592 = vmatprep.subr.bf16.mxu0 %v2928_v42 }
  0xfd   :  { %2563 = vmatpush3.bf16.xpose.msra.mxu1 %v468_v8  ;;  %v3168_v9 = vpop.f32.mrb[12].mxu0  ;;  %2564 = vmatprep.mubr.msk.bf16.mxu1 %vm2929_vm2, %v2928_v42 }
  0xfe   :  { %v3172_v10 = vpop.f32.mrb[13].mxu0  ;;  %2574 = vmatprep.subr.bf16.mxu1 %v2928_v42  ;;  %1001 = vrot.lane.b32.xlu1 %v223_v2, %s2930_s29 }
  0xff   :  { %v3178_v12 = vpop.f32.mrb[14].mxu0  ;;  %954 = vrot.lane.b32.xlu0 %v222_v5, %s2930_s29 }
 0x100   :  { %v225_v14 = vpack.c.bf16 %v3178_v12, %v3168_v9  ;;  %v3185_v15 = vpop.f32.mrb[15].mxu0 }
 0x101   :  { %v224_v17 = vpack.c.bf16 %v3185_v15, %v3172_v10 }
 0x102   :  { %2583 = vmatmul.mubr.msk.bf16.vlgmr.msra.gmra.mrb[20].mxu0 %vm262_vm1, %v37_v11  ;;  %v698_v18 = vsel %vm262_vm1, %v225_v14, 0  ;;  %1095 = vrot.lane.b32.xlu1 %v225_v14, %s2930_s29 }
 0x103   :  { %2593 = vmatpush3.bf16.xpose.msra.mxu0 %v698_v18  ;;  %2594 = vmatprep.mubr.msk.bf16.mxu0 %vm2929_vm2, %v2928_v42  ;;  %v652_v21 = vsel %vm262_vm1, %v224_v17, 0 }
 0x104   :  { %2565 = vmatmul.mubr.msk.bf16.vlgmr.msra.gmra.mrb[16].mxu1 %vm262_vm1, %v34_v13  ;;  %1048 = vrot.lane.b32.xlu0 %v224_v17, %s2930_s29 }
 0x105   :  { %2575 = vmatpush3.bf16.xpose.msra.mxu1 %v560_v16  ;;  %2576 = vmatprep.mubr.msk.bf16.mxu1 %vm2929_vm2, %v2928_v42 }
 0x106   :  { %2586 = vmatprep.subr.bf16.mxu1 %v2928_v42  ;;  %2604 = vmatprep.subr.bf16.mxu0 %v2928_v42 }
 0x10a   :  { %2595 = vmatmul.mubr.msk.bf16.vlgmr.msra.gmra.mrb[24].mxu0 %vm262_vm1, %v39_v19 }
 0x10b   :  { %2606 = vmatprep.mubr.msk.bf16.mxu0 %vm2929_vm2, %v2928_v42 }
 0x10c   :  { %2577 = vmatmul.mubr.msk.bf16.vlgmr.msra.gmra.mrb[20].mxu1 %vm262_vm1, %v36_v20 }
 0x10d   :  { %2587 = vmatpush3.bf16.xpose.msra.mxu1 %v652_v21  ;;  %2588 = vmatprep.mubr.msk.bf16.mxu1 %vm2929_vm2, %v2928_v42 }
 0x10e   :  { %2598 = vmatprep.subr.bf16.mxu1 %v2928_v42 }
 0x114   :  { %2589 = vmatmul.mubr.msk.bf16.vlgmr.msra.gmra.mrb[24].mxu1 %vm262_vm1, %v38_v22 }
 0x115   :  { %2600 = vmatprep.mubr.msk.bf16.mxu1 %vm2929_vm2, %v2928_v42 }
 0x15d   :  { %v766_v27 = vpop.permute.xlu0 %765 }
 0x15e   :  { %2599 = vmatpush3.bf16.msra.mxu1 %v766_v27 }
 0x15f   :  { %2610 = vmatprep.subr.bf16.mxu1 %v2928_v42 }
 0x161   :  { %v814_v28 = vpop.permute.xlu0 %813 }
 0x162   :  { %2605 = vmatpush3.bf16.msra.mxu0 %v814_v28 }
 0x163   :  { %2616 = vmatprep.subr.bf16.mxu0 %v2928_v42 }
 0x165   :  { %v861_v48 = vpop.permute.xlu1 %860 }
 0x169   :  { %v908_v7 = vpop.permute.xlu1 %907 }
 0x170   :  { %v1002_v28 = vpop.permute.xlu1 %1001 }
 0x1c7   :  { %v412_v29 = vpop.f32.mrb[8].mxu1 }
 0x1c8   :  { %2744 = vtanh.f32 %v412_v29  ;;  %v2554_v30 = vpop.f32.mrb[9].mxu1 }
 0x1c9   :  { %v415_v31 = vpop.f32.mrb[10].mxu1  ;;  %v955_v30 = vpop.permute.xlu0 %954 }
 0x1ca   :  { %v2555_v32 = vpop.f32.mrb[11].mxu1 }
 0x1cd   :  { %v550_v33 = vpop.f32.mrb[16].mxu0 }
 0x1ce   :  { %v2572_v34 = vpop.f32.mrb[17].mxu0 }
 0x1cf   :  { %v458_v35 = vpop.f32.mrb[12].mxu1  ;;  %v553_v36 = vpop.f32.mrb[18].mxu0 }
 0x1d0   :  { %2746 = vtanh.f32 %v458_v35  ;;  %v2560_v37 = vpop.f32.mrb[13].mxu1  ;;  %v2573_v38 = vpop.f32.mrb[19].mxu0 }
 0x1d1   :  { %v461_v39 = vpop.f32.mrb[14].mxu1  ;;  %2748 = vtanh.f32 %v550_v33 }
 0x1d2   :  { %v2745_v40 = vpop.eup %2744  ;;  %v2561_v41 = vpop.f32.mrb[15].mxu1 }
 0x1d3   :  { %v748_v46 = vpack.c.bf16 %v2745_v40, %v2745_v40  ;;  %v1096_v39 = vpop.permute.xlu1 %1095  ;;  %v1049_v41 = vpop.permute.xlu0 %1048 }
 0x1d5   :  { %1404 = vxpose.xlu0.c.b16.start.end [1/1] (short) (narrow) %v748_v46, 16  ;;  %2601 = vmatmul.mubr.msk.bf16.vlgmr.msra.gmra.mrb[28].mxu1 %vm768_vm3, %v748_v46  ;;  %v642_v49 = vpop.f32.mrb[20].mxu0  ;;  %v3252_v46 = vpack.c.bf16 %v3159_v6, %v3159_v6 }
 0x1d6   :  { %2611 = vmatpush3.bf16.msra.mxu1 %v861_v48  ;;  %v2584_v53 = vpop.f32.mrb[21].mxu0  ;;  %2612 = vmatprep.mubr.msk.bf16.mxu1 %vm2929_vm2, %v2928_v42 }
 0x1d7   :  { %v504_v54 = vpop.f32.mrb[16].mxu1  ;;  %v645_v56 = vpop.f32.mrb[22].mxu0  ;;  %2622 = vmatprep.subr.bf16.mxu1 %v2928_v42 }
 0x1d8   :  { %2750 = vtanh.f32 %v504_v54  ;;  %v2566_v57 = vpop.f32.mrb[17].mxu1  ;;  %v2585_v58 = vpop.f32.mrb[23].mxu0  ;;  %v1505_v54 = vsel %vm1432_vm4, %v3252_v46, 0  ;;  %v2698_v56 = vpack.i.bf16 %v3106_v47, %v3100_v44  ;;  %v2713_v44 = vpack.i.bf16 %v3118_v52, %v3112_v50 }
 0x1d9   :  { %v507_v60 = vpop.f32.mrb[18].mxu1  ;;  %2752 = vtanh.f32 %v642_v49  ;;  %v3258_v49 = vpack.c.bf16 %v3147_v0, %v3147_v0  ;;  %v2708_v0 = vpack.i.bf16 %v3124_v55, %v3115_v51  ;;  %v2733_v57 = vpack.i.bf16 %v3178_v12, %v3168_v9 }
 0x1da   :  { %v2747_v1 = vpop.eup %2746  ;;  %v2567_v2 = vpop.f32.mrb[19].mxu1  ;;  %v2703_v51 = vpack.i.bf16 %v3102_v45, %v3098_v43  ;;  %v2718_v47 = vpack.i.bf16 %v3153_v3, %v3139_v61  ;;  %v2723_v55 = vpack.i.bf16 %v3145_v63, %v3133_v59  ;;  %v2728_v43 = vpack.i.bf16 %v3185_v15, %v3172_v10 }
 0x1db   :  { %v749_v5 = vpack.c.bf16 %v2747_v1, %v2747_v1  ;;  %v2749_v11 = vpop.eup %2748  ;;  %v1434_v6 = vsel %vm1432_vm4, %v3258_v49, 0  ;;  %v3298_v45 = vpack.c.bf16 %v3142_v62, %v3142_v62  ;;  %v2443_v59 = vpack.c.bf16 %v3155_v4, %v3155_v4 }
 0x1dc   :  { %v751_v19 = vpack.c.bf16 %v2749_v11, %v2749_v11  ;;  %v3315_v63 = vpack.c.bf16 %v3220_v24, %v3220_v24  ;;  %v3321_v4 = vpack.c.bf16 %v3224_v26, %v3224_v26  ;;  %v3332_v15 = vpack.c.bf16 %v3218_v23, %v3218_v23 }
 0x1dd   :  { %1477 = vxpose.xlu1.c.b16.start.end [1/1] (short) (narrow) %v749_v5, 16  ;;  %2607 = vmatmul.mubr.msk.bf16.vlgmr.msra.gmra.mrb[28].mxu0 %vm768_vm3, %v749_v5  ;;  %v734_v8 = vpop.f32.mrb[24].mxu0  ;;  %v1576_v52 = vsel %vm1432_vm4, %v3298_v45, 0  ;;  %v1647_v62 = vsel %vm1432_vm4, %v2443_v59, 0  ;;  %v3339_v24 = vpack.c.bf16 %v3222_v25, %v3222_v25  ;;  %v756_v2 = vunpack.c.l.bf16 %v3258_v49 }
 0x1de   :  { %2617 = vmatpush3.bf16.msra.mxu0 %v908_v7  ;;  %2618 = vmatprep.mubr.msk.bf16.mxu0 %vm2929_vm2, %v2928_v42  ;;  %v2596_v13 = vpop.f32.mrb[25].mxu0  ;;  %2754 = vtanh.f32 %v734_v8  ;;  %v1718_v9 = vsel %vm1432_vm4, %v3315_v63, 0  ;;  %v1789_v12 = vsel %vm1432_vm4, %v3321_v4, 0  ;;  %v1860_v58 = vsel %vm1432_vm4, %v3332_v15, 0 }
 0x1df   :  { %v596_v14 = vpop.f32.mrb[20].mxu1  ;;  %2628 = vmatprep.subr.bf16.mxu0 %v2928_v42  ;;  %v737_v17 = vpop.f32.mrb[26].mxu0  ;;  %v1931_v23 = vsel %vm1432_vm4, %v3339_v24, 0 }
 0x1e0   :  { %2756 = vtanh.f32 %v596_v14  ;;  %v2578_v18 = vpop.f32.mrb[21].mxu1  ;;  %v2597_v16 = vpop.f32.mrb[27].mxu0  ;;  %v757_v14 = vunpack.c.l.bf16 %v3252_v46  ;;  %v761_v46 = vunpack.c.l.bf16 %v3321_v4 }
 0x1e1   :  { %v599_v20 = vpop.f32.mrb[22].mxu1 }
 0x1e2   :  { %v2751_v21 = vpop.eup %2750  ;;  %v2579_v22 = vpop.f32.mrb[23].mxu1  ;;  %v3358_v20 = vld [vmem:[%s3672_s4] ss:$0 sm:$0xff] }
 0x1e3   :  { %v750_v27 = vpack.c.bf16 %v2751_v21, %v2751_v21  ;;  %v2753_v29 = vpop.eup %2752 }
 0x1e4   :  { %v753_v34 = vpack.c.bf16 %v2753_v29, %v2753_v29 }
 0x1e5   :  { %2619 = vmatmul.mubr.msk.bf16.vlgmr.msra.gmra.mrb[32].mxu0 %vm768_vm3, %v751_v19  ;;  %1548 = vxpose.xlu0.c.b16.start.end [1/1] (short) (narrow) %v750_v27, 16 }
 0x1e6   :  { %2629 = vmatpush3.bf16.msra.mxu0 %v1002_v28  ;;  %2613 = vmatmul.mubr.msk.bf16.vlgmr.msra.gmra.mrb[32].mxu1 %vm768_vm3, %v750_v27  ;;  %v759_v27 = vunpack.c.l.bf16 %v2443_v59  ;;  %v758_v28 = vunpack.c.l.bf16 %v3298_v45 }
 0x1e7   :  { %2623 = vmatpush3.bf16.msra.mxu1 %v955_v30  ;;  %v688_v31 = vpop.f32.mrb[24].mxu1  ;;  %2624 = vmatprep.mubr.msk.bf16.mxu1 %vm2929_vm2, %v2928_v42 }
 0x1e8   :  { %2758 = vtanh.f32 %v688_v31  ;;  %2630 = vmatprep.mubr.msk.bf16.mxu0 %vm2929_vm2, %v2928_v42  ;;  %2634 = vmatprep.subr.bf16.mxu1 %v2928_v42  ;;  %v2590_v32 = vpop.f32.mrb[25].mxu1  ;;  %v2755_v33 = vpop.eup %2754 }
 0x1e9   :  { %1619 = vxpose.xlu0.c.b16.start.end [1/1] (short) (narrow) %v751_v19, 16  ;;  %2640 = vmatprep.subr.bf16.mxu0 %v2928_v42  ;;  %v691_v35 = vpop.f32.mrb[26].mxu1  ;;  %v755_v40 = vpack.c.bf16 %v2755_v33, %v2755_v33 }
 0x1ea   :  { %v2757_v36 = vpop.eup %2756  ;;  %v2591_v37 = vpop.f32.mrb[27].mxu1 }
 0x1eb   :  { %v752_v38 = vpack.c.bf16 %v2757_v36, %v2757_v36 }
 0x1ed   :  { %2631 = vmatmul.mubr.msk.bf16.vlgmr.msra.gmra.mrb[36].mxu0 %vm768_vm3, %v753_v34  ;;  %1761 = vxpose.xlu0.c.b16.start.end [1/1] (short) (narrow) %v753_v34, 16 }
 0x1ee   :  { %2641 = vmatpush3.bf16.msra.mxu0 %v1096_v39  ;;  %1690 = vxpose.xlu1.c.b16.start.end [1/1] (short) (narrow) %v752_v38, 16 }
 0x1ef   :  { %2625 = vmatmul.mubr.msk.bf16.vlgmr.msra.gmra.mrb[36].mxu1 %vm768_vm3, %v752_v38  ;;  %2642 = vmatprep.mubr.msk.bf16.mxu0 %vm2929_vm2, %v2928_v42 }
 0x1f0   :  { %2635 = vmatpush3.bf16.msra.mxu1 %v1049_v41  ;;  %2636 = vmatprep.mubr.msk.bf16.mxu1 %vm2929_vm2, %v2928_v42 }
 0x1f1   :  { %1903 = vxpose.xlu0.c.b16.start.end [1/1] (short) (narrow) %v755_v40, 16  ;;  %2646 = vmatprep.subr.bf16.mxu1 %v2928_v42 }
 0x1f2   :  { %v2759_v48 = vpop.eup %2758  ;;  %2652 = vmatprep.subr.bf16.mxu0 %v2928_v42 }
 0x1f3   :  { %v754_v53 = vpack.c.bf16 %v2759_v48, %v2759_v48 }
 0x1f5   :  { %2643 = vmatmul.mubr.msk.bf16.vlgmr.msra.gmra.mrb[40].mxu0 %vm768_vm3, %v755_v40  ;;  %1832 = vxpose.xlu1.c.b16.start.end [1/1] (short) (narrow) %v754_v53, 16 }
 0x1f6   :  { %2653 = vmatpush3.bf16.msra.mxu0 %v1505_v54  ;;  %2654 = vmatprep.mubr.msk.bf16.mxu0 %vm2929_vm2, %v2928_v42 }
 0x1f7   :  { %2637 = vmatmul.mubr.msk.bf16.vlgmr.msra.gmra.mrb[40].mxu1 %vm768_vm3, %v754_v53  ;;  %2664 = vmatprep.subr.bf16.mxu0 %v2928_v42  ;;  %v760_v53 = vunpack.c.l.bf16 %v3315_v63  ;;  %v762_v63 = vunpack.c.l.bf16 %v3332_v15 }
 0x1f8   :  { %2647 = vmatpush3.bf16.msra.mxu1 %v1434_v6  ;;  %2648 = vmatprep.mubr.msk.bf16.mxu1 %vm2929_vm2, %v2928_v42 }
 0x1f9   :  { %2709 = vrot.lane.b32.xlu1 %v2708_v0, %s2930_s29  ;;  %2658 = vmatprep.subr.bf16.mxu1 %v2928_v42 }
 0x1fa   :  { %2699 = vrot.lane.b32.xlu0 %v2698_v56, %s2930_s29 }
 0x1fd   :  { %2734 = vrot.lane.b32.xlu1 %v2733_v57, %s2930_s29 }
 0x1fe   :  { %2704 = vrot.lane.b32.xlu0 %v2703_v51, %s2930_s29 }
 0x202   :  { %2714 = vrot.lane.b32.xlu0 %v2713_v44, %s2930_s29 }
 0x206   :  { %2719 = vrot.lane.b32.xlu0 %v2718_v47, %s2930_s29 }
 0x20a   :  { %2724 = vrot.lane.b32.xlu0 %v2723_v55, %s2930_s29 }
 0x20e   :  { %2729 = vrot.lane.b32.xlu0 %v2728_v43, %s2930_s29 }
 0x23b   :  { %v1412_v50 = vpop.trf.xlu0 }
 0x23c   :  { %2649 = vmatmul.mubr.msk.bf16.vlgmr.msra.gmra.mrb[44].mxu1 %vm1428_vm5, %v1412_v50 }
 0x23d   :  { %2659 = vmatpush3.bf16.msra.mxu1 %v1576_v52  ;;  %2660 = vmatprep.mubr.msk.bf16.mxu1 %vm2929_vm2, %v2928_v42  ;;  %v763_v52 = vunpack.c.l.bf16 %v3339_v24 }
 0x23e   :  { %2670 = vmatprep.subr.bf16.mxu1 %v2928_v42 }
 0x243   :  { %v1485_v61 = vpop.trf.xlu1 }
 0x244   :  { %2655 = vmatmul.mubr.msk.bf16.vlgmr.msra.gmra.mrb[44].mxu0 %vm1428_vm5, %v1485_v61 }
 0x245   :  { %2665 = vmatpush3.bf16.msra.mxu0 %v1647_v62  ;;  %2666 = vmatprep.mubr.msk.bf16.mxu0 %vm2929_vm2, %v2928_v42 }
 0x246   :  { %2676 = vmatprep.subr.bf16.mxu0 %v2928_v42 }
 0x24b   :  { %v1556_v3 = vpop.trf.xlu0 }
 0x24c   :  { %2661 = vmatmul.mubr.msk.bf16.vlgmr.msra.gmra.mrb[48].mxu1 %vm1428_vm5, %v1556_v3 }
 0x24d   :  { %2671 = vmatpush3.bf16.msra.mxu1 %v1718_v9  ;;  %2672 = vmatprep.mubr.msk.bf16.mxu1 %vm2929_vm2, %v2928_v42 }
 0x24e   :  { %2682 = vmatprep.subr.bf16.mxu1 %v2928_v42 }
 0x24f   :  { %v1627_v10 = vpop.trf.xlu0 }
 0x250   :  { %2667 = vmatmul.mubr.msk.bf16.vlgmr.msra.gmra.mrb[48].mxu0 %vm1428_vm5, %v1627_v10 }
 0x251   :  { %2677 = vmatpush3.bf16.msra.mxu0 %v1789_v12  ;;  %2678 = vmatprep.mubr.msk.bf16.mxu0 %vm2929_vm2, %v2928_v42 }
 0x252   :  { %2688 = vmatprep.subr.bf16.mxu0 %v2928_v42 }
 0x253   :  { %v1769_v60 = vpop.trf.xlu0 }
 0x254   :  { %v1698_v26 = vpop.trf.xlu1 }
 0x255   :  { %2673 = vmatmul.mubr.msk.bf16.vlgmr.msra.gmra.mrb[52].mxu1 %vm1428_vm5, %v1698_v26 }
 0x256   :  { %2683 = vmatpush3.bf16.msra.mxu1 %v1860_v58  ;;  %2684 = vmatprep.mubr.msk.bf16.mxu1 %vm2929_vm2, %v2928_v42 }
 0x257   :  { %v1911_v1 = vpop.trf.xlu0 }
 0x258   :  { %2679 = vmatmul.mubr.msk.bf16.vlgmr.msra.gmra.mrb[52].mxu0 %vm1428_vm5, %v1769_v60 }
 0x259   :  { %2689 = vmatpush3.bf16.msra.mxu0 %v1931_v23  ;;  %2690 = vmatprep.mubr.msk.bf16.mxu0 %vm2929_vm2, %v2928_v42 }
 0x25b   :  { %v1840_v25 = vpop.trf.xlu1 }
 0x25d   :  { %2685 = vmatmul.mubr.msk.bf16.vlgmr.msra.gmra.mrb[56].mxu1 %vm1428_vm5, %v1840_v25 }
 0x260   :  { %2691 = vmatmul.mubr.msk.bf16.vlgmr.msra.gmra.mrb[56].mxu0 %vm1428_vm5, %v1911_v1 }
 0x2a8   :  { %v806_v5 = vpop.f32.mrb[28].mxu1 }
 0x2a9   :  { %v807_v7 = vadd.f32 %v806_v5, %v756_v2  ;;  %v2602_v8 = vpop.f32.mrb[29].mxu1 }
 0x2aa   :  { %v809_v11 = vpop.f32.mrb[30].mxu1 }
 0x2ab   :  { %2760 = vtanh.f32 %v807_v7  ;;  %v2603_v13 = vpop.f32.mrb[31].mxu1 }
 0x2b0   :  { %v853_v17 = vpop.f32.mrb[28].mxu0 }
 0x2b1   :  { %v854_v18 = vadd.f32 %v853_v17, %v757_v14  ;;  %v2608_v16 = vpop.f32.mrb[29].mxu0 }
 0x2b2   :  { %v856_v42 = vpop.f32.mrb[30].mxu0  ;;  %v2700_v16 = vpop.permute.xlu0 %2699 }
 0x2b3   :  { %2762 = vtanh.f32 %v854_v18  ;;  %v2609_v19 = vpop.f32.mrb[31].mxu0 }
 0x2b5   :  { %v2761_v21 = vpop.eup %2760 }
 0x2b6   :  { %v1156_v22 = vmul.f32 %v2761_v21, %v3358_v20 }
 0x2b8   :  { %v947_v29 = vpop.f32.mrb[32].mxu0  ;;  %v1164_v30 = vsel %vm262_vm1, %v1156_v22, 0.0 }
 0x2b9   :  { %v900_v31 = vpop.f32.mrb[32].mxu1  ;;  %v948_v32 = vadd.f32 %v947_v29, %v759_v27  ;;  %1165 = vadd.xlane.f32.xlu1 %v1164_v30  ;;  %v2620_v33 = vpop.f32.mrb[33].mxu0 }
 0x2ba   :  { %v901_v34 = vadd.f32 %v900_v31, %v758_v28  ;;  %v2614_v35 = vpop.f32.mrb[33].mxu1  ;;  %v950_v36 = vpop.f32.mrb[34].mxu0 }
 0x2bb   :  { %2764 = vtanh.f32 %v948_v32  ;;  %v903_v37 = vpop.f32.mrb[34].mxu1  ;;  %v2621_v38 = vpop.f32.mrb[35].mxu0  ;;  %v3384_v35 = vld [vmem:[%s3673_s5] ss:$0 sm:$0xff] }
 0x2bc   :  { %2766 = vtanh.f32 %v901_v34  ;;  %v2615_v39 = vpop.f32.mrb[35].mxu1  ;;  %v2705_v29 = vpop.permute.xlu0 %2704 }
 0x2bd   :  { %v2763_v40 = vpop.eup %2762  ;;  %v2710_v37 = vpop.permute.xlu1 %2709 }
 0x2be   :  { %v1157_v41 = vmul.f32 %v2763_v40, %v3358_v20 }
 0x2c0   :  { %v1041_v48 = vpop.f32.mrb[36].mxu0  ;;  %v1167_v49 = vsel %vm262_vm1, %v1157_v41, 0.0  ;;  %v2715_v34 = vpop.permute.xlu0 %2714 }
 0x2c1   :  { %v1042_v54 = vadd.f32 %v1041_v48, %v761_v46  ;;  %1168 = vadd.xlane.f32.xlu0 %v1167_v49  ;;  %v2632_v6 = vpop.f32.mrb[37].mxu0 }
 0x2c2   :  { %v994_v0 = vpop.f32.mrb[36].mxu1  ;;  %v1044_v56 = vpop.f32.mrb[38].mxu0 }
 0x2c3   :  { %v995_v57 = vadd.f32 %v994_v0, %v760_v53  ;;  %2768 = vtanh.f32 %v1042_v54  ;;  %v2626_v51 = vpop.f32.mrb[37].mxu1  ;;  %v2633_v44 = vpop.f32.mrb[39].mxu0 }
 0x2c4   :  { %v997_v47 = vpop.f32.mrb[38].mxu1  ;;  %v2720_v49 = vpop.permute.xlu0 %2719 }
 0x2c5   :  { %v2765_v55 = vpop.eup %2764  ;;  %2770 = vtanh.f32 %v995_v57  ;;  %v2627_v43 = vpop.f32.mrb[39].mxu1 }
 0x2c6   :  { %v2767_v45 = vpop.eup %2766  ;;  %v1159_v50 = vmul.f32 %v2765_v55, %v3358_v20 }
 0x2c7   :  { %v1158_v59 = vmul.f32 %v2767_v45, %v3358_v20 }
 0x2c8   :  { %v1135_v61 = vpop.f32.mrb[40].mxu0  ;;  %v1173_v62 = vsel %vm262_vm1, %v1159_v50, 0.0 }
 0x2c9   :  { %v1136_v3 = vadd.f32 %v1135_v61, %v763_v52  ;;  %1174 = vadd.xlane.f32.xlu0 %v1173_v62  ;;  %v1170_v9 = vsel %vm262_vm1, %v1158_v59, 0.0  ;;  %v2644_v4 = vpop.f32.mrb[41].mxu0  ;;  %v2725_v52 = vpop.permute.xlu0 %2724 }
 0x2ca   :  { %v1088_v10 = vpop.f32.mrb[40].mxu1  ;;  %1171 = vadd.xlane.f32.xlu1 %v1170_v9  ;;  %v1138_v12 = vpop.f32.mrb[42].mxu0 }
 0x2cb   :  { %v1089_v26 = vadd.f32 %v1088_v10, %v762_v63  ;;  %2772 = vtanh.f32 %v1136_v3  ;;  %v2638_v58 = vpop.f32.mrb[41].mxu1  ;;  %v2645_v60 = vpop.f32.mrb[43].mxu0 }
 0x2cc   :  { %v1091_v24 = vpop.f32.mrb[42].mxu1 }
 0x2cd   :  { %v2769_v23 = vpop.eup %2768  ;;  %2774 = vtanh.f32 %v1089_v26  ;;  %v2639_v25 = vpop.f32.mrb[43].mxu1 }
 0x2ce   :  { %v1161_v1 = vmul.f32 %v2769_v23, %v3358_v20  ;;  %v2730_v23 = vpop.permute.xlu0 %2729 }
 0x2cf   :  { %v2771_v2 = vpop.eup %2770 }
 0x2d0   :  { %v1179_v15 = vsel %vm262_vm1, %v1161_v1, 0.0  ;;  %v1160_v5 = vmul.f32 %v2771_v2, %v3358_v20 }
 0x2d1   :  { %1180 = vadd.xlane.f32.xlu1 %v1179_v15 }
 0x2d2   :  { %v1176_v7 = vsel %vm262_vm1, %v1160_v5, 0.0 }
 0x2d3   :  { %1177 = vadd.xlane.f32.xlu0 %v1176_v7 }
 0x2d5   :  { %v2773_v8 = vpop.eup %2772 }
 0x2d6   :  { %v1163_v11 = vmul.f32 %v2773_v8, %v3358_v20 }
 0x2d7   :  { %v2775_v13 = vpop.eup %2774 }
 0x2d8   :  { %v1185_v14 = vsel %vm262_vm1, %v1163_v11, 0.0  ;;  %v1162_v17 = vmul.f32 %v2775_v13, %v3358_v20  ;;  %v2735_v11 = vpop.permute.xlu1 %2734 }
 0x2d9   :  { %1186 = vadd.xlane.f32.xlu1 %v1185_v14 }
 0x2da   :  { %v1182_v18 = vsel %vm262_vm1, %v1162_v17, 0.0 }
 0x2db   :  { %1183 = vadd.xlane.f32.xlu0 %v1182_v18 }
 0x30f   :  { %v1470_v42 = vpop.f32.mrb[44].mxu1 }
 0x310   :  { %v2912_v19 = vadd.low.f32.bf16 %v1470_v42, %v2700_v16  ;;  %v2650_v21 = vpop.f32.mrb[45].mxu1 }
 0x311   :  { %v1473_v22 = vpop.f32.mrb[46].mxu1 }
 0x312   :  { %2776 = vtanh.f32 %v2912_v19  ;;  %v2913_v27 = vadd.high.f32.bf16 %v1473_v22, %v2700_v16  ;;  %v2651_v28 = vpop.f32.mrb[47].mxu1 }
 0x314   :  { %2778 = vtanh.f32 %v2913_v27 }
 0x317   :  { %v1541_v30 = vpop.f32.mrb[44].mxu0 }
 0x318   :  { %v2914_v31 = vadd.low.f32.bf16 %v1541_v30, %v2705_v29  ;;  %v2656_v32 = vpop.f32.mrb[45].mxu0 }
 0x319   :  { %v1544_v33 = vpop.f32.mrb[46].mxu0 }
 0x31a   :  { %2780 = vtanh.f32 %v2914_v31  ;;  %v2915_v20 = vadd.high.f32.bf16 %v1544_v33, %v2705_v29  ;;  %v2657_v36 = vpop.f32.mrb[47].mxu0 }
 0x31c   :  { %v2777_v38 = vpop.eup %2776  ;;  %2782 = vtanh.f32 %v2915_v20 }
 0x31d   :  { %v1997_v39 = vmul.f32 %v2777_v38, %v3384_v35 }
 0x31e   :  { %v2779_v40 = vpop.eup %2778 }
 0x31f   :  { %v1612_v41 = vpop.f32.mrb[48].mxu1  ;;  %v2013_v46 = vsel %vm262_vm1, %v1997_v39, 0.0  ;;  %v1998_v48 = vmul.f32 %v2779_v40, %v3384_v35 }
 0x320   :  { %v2916_v53 = vadd.low.f32.bf16 %v1612_v41, %v2710_v37  ;;  %2014 = vadd.xlane.f32.xlu0 %v2013_v46  ;;  %v2662_v54 = vpop.f32.mrb[49].mxu1 }
 0x321   :  { %v1615_v6 = vpop.f32.mrb[50].mxu1  ;;  %v2016_v0 = vsel %vm262_vm1, %v1998_v48, 0.0 }
 0x322   :  { %2784 = vtanh.f32 %v2916_v53  ;;  %v2917_v56 = vadd.high.f32.bf16 %v1615_v6, %v2710_v37  ;;  %2017 = vadd.xlane.f32.xlu1 %v2016_v0  ;;  %v2663_v57 = vpop.f32.mrb[51].mxu1 }
 0x323   :  { %v1683_v51 = vpop.f32.mrb[48].mxu0 }
 0x324   :  { %v2781_v44 = vpop.eup %2780  ;;  %2786 = vtanh.f32 %v2917_v56  ;;  %v2918_v47 = vadd.low.f32.bf16 %v1683_v51, %v2715_v34  ;;  %v2668_v55 = vpop.f32.mrb[49].mxu0 }
 0x325   :  { %v1686_v43 = vpop.f32.mrb[50].mxu0  ;;  %v1999_v45 = vmul.f32 %v2781_v44, %v3384_v35 }
 0x326   :  { %v2783_v50 = vpop.eup %2782  ;;  %2788 = vtanh.f32 %v2918_v47  ;;  %v2919_v59 = vadd.high.f32.bf16 %v1686_v43, %v2715_v34  ;;  %v2669_v61 = vpop.f32.mrb[51].mxu0 }
 0x327   :  { %v2019_v62 = vsel %vm262_vm1, %v1999_v45, 0.0  ;;  %v2000_v63 = vmul.f32 %v2783_v50, %v3384_v35 }
 0x328   :  { %2790 = vtanh.f32 %v2919_v59  ;;  %v1754_v3 = vpop.f32.mrb[52].mxu1  ;;  %2020 = vadd.xlane.f32.xlu0 %v2019_v62 }
 0x329   :  { %v2920_v9 = vadd.low.f32.bf16 %v1754_v3, %v2720_v49  ;;  %v2674_v4 = vpop.f32.mrb[53].mxu1  ;;  %v2022_v10 = vsel %vm262_vm1, %v2000_v63, 0.0 }
 0x32a   :  { %v1757_v12 = vpop.f32.mrb[54].mxu1  ;;  %2023 = vadd.xlane.f32.xlu1 %v2022_v10 }
 0x32b   :  { %2792 = vtanh.f32 %v2920_v9  ;;  %v2921_v26 = vadd.high.f32.bf16 %v1757_v12, %v2720_v49  ;;  %v1825_v58 = vpop.f32.mrb[52].mxu0  ;;  %v2675_v60 = vpop.f32.mrb[55].mxu1 }
 0x32c   :  { %v2785_v24 = vpop.eup %2784  ;;  %v2922_v25 = vadd.low.f32.bf16 %v1825_v58, %v2725_v52  ;;  %v2680_v1 = vpop.f32.mrb[53].mxu0 }
 0x32d   :  { %2794 = vtanh.f32 %v2921_v26  ;;  %v1828_v2 = vpop.f32.mrb[54].mxu0  ;;  %v2001_v15 = vmul.f32 %v2785_v24, %v3384_v35 }
 0x32e   :  { %v2787_v5 = vpop.eup %2786  ;;  %2796 = vtanh.f32 %v2922_v25  ;;  %v2923_v7 = vadd.high.f32.bf16 %v1828_v2, %v2725_v52  ;;  %v2681_v8 = vpop.f32.mrb[55].mxu0 }
 0x32f   :  { %v2025_v13 = vsel %vm262_vm1, %v2001_v15, 0.0  ;;  %v2002_v14 = vmul.f32 %v2787_v5, %v3384_v35 }
 0x330   :  { %v2789_v17 = vpop.eup %2788  ;;  %2798 = vtanh.f32 %v2923_v7  ;;  %v1896_v18 = vpop.f32.mrb[56].mxu1  ;;  %2026 = vadd.xlane.f32.xlu0 %v2025_v13 }
 0x331   :  { %v2924_v16 = vadd.low.f32.bf16 %v1896_v18, %v2730_v23  ;;  %v2686_v42 = vpop.f32.mrb[57].mxu1  ;;  %v2028_v19 = vsel %vm262_vm1, %v2002_v14, 0.0  ;;  %v2003_v21 = vmul.f32 %v2789_v17, %v3384_v35 }
 0x332   :  { %v2791_v22 = vpop.eup %2790  ;;  %v1899_v27 = vpop.f32.mrb[58].mxu1  ;;  %2029 = vadd.xlane.f32.xlu1 %v2028_v19 }
 0x333   :  { %2800 = vtanh.f32 %v2924_v16  ;;  %v2925_v28 = vadd.high.f32.bf16 %v1899_v27, %v2730_v23  ;;  %v1967_v29 = vpop.f32.mrb[56].mxu0  ;;  %v2031_v30 = vsel %vm262_vm1, %v2003_v21, 0.0  ;;  %v2004_v31 = vmul.f32 %v2791_v22, %v3384_v35  ;;  %v2687_v32 = vpop.f32.mrb[59].mxu1 }
 0x334   :  { %v2926_v33 = vadd.low.f32.bf16 %v1967_v29, %v2735_v11  ;;  %v2692_v34 = vpop.f32.mrb[57].mxu0  ;;  %2032 = vadd.xlane.f32.xlu0 %v2031_v30 }
 0x335   :  { %v2793_v20 = vpop.eup %2792  ;;  %2802 = vtanh.f32 %v2925_v28  ;;  %v1970_v36 = vpop.f32.mrb[58].mxu0  ;;  %v2034_v37 = vsel %vm262_vm1, %v2004_v31, 0.0 }
 0x336   :  { %2804 = vtanh.f32 %v2926_v33  ;;  %v2927_v38 = vadd.high.f32.bf16 %v1970_v36, %v2735_v11  ;;  %2035 = vadd.xlane.f32.xlu1 %v2034_v37  ;;  %v2005_v39 = vmul.f32 %v2793_v20, %v3384_v35  ;;  %v2693_v40 = vpop.f32.mrb[59].mxu0 }
 0x337   :  { %v2795_v41 = vpop.eup %2794 }
 0x338   :  { %v2797_v46 = vpop.eup %2796  ;;  %2806 = vtanh.f32 %v2927_v38  ;;  %v2037_v48 = vsel %vm262_vm1, %v2005_v39, 0.0  ;;  %v2006_v49 = vmul.f32 %v2795_v41, %v3384_v35 }
 0x339   :  { %2038 = vadd.xlane.f32.xlu0 %v2037_v48  ;;  %v2007_v53 = vmul.f32 %v2797_v46, %v3384_v35 }
 0x33a   :  { %v2799_v54 = vpop.eup %2798  ;;  %v2040_v6 = vsel %vm262_vm1, %v2006_v49, 0.0 }
 0x33b   :  { %2041 = vadd.xlane.f32.xlu1 %v2040_v6  ;;  %v2043_v0 = vsel %vm262_vm1, %v2007_v53, 0.0  ;;  %v2008_v56 = vmul.f32 %v2799_v54, %v3384_v35 }
 0x33d   :  { %v2801_v57 = vpop.eup %2800  ;;  %2044 = vadd.xlane.f32.xlu0 %v2043_v0  ;;  %v2046_v51 = vsel %vm262_vm1, %v2008_v56, 0.0 }
 0x33e   :  { %v2009_v44 = vmul.f32 %v2801_v57, %v3384_v35 }
 0x33f   :  { %v2803_v47 = vpop.eup %2802  ;;  %2047 = vadd.xlane.f32.xlu1 %v2046_v51 }
 0x340   :  { %v2805_v55 = vpop.eup %2804  ;;  %v2049_v43 = vsel %vm262_vm1, %v2009_v44, 0.0  ;;  %v2010_v45 = vmul.f32 %v2803_v47, %v3384_v35 }
 0x341   :  { %2050 = vadd.xlane.f32.xlu0 %v2049_v43  ;;  %v2011_v50 = vmul.f32 %v2805_v55, %v3384_v35 }
 0x342   :  { %v2807_v52 = vpop.eup %2806  ;;  %v2052_v59 = vsel %vm262_vm1, %v2010_v45, 0.0 }
 0x343   :  { %2053 = vadd.xlane.f32.xlu1 %v2052_v59  ;;  %v2055_v61 = vsel %vm262_vm1, %v2011_v50, 0.0  ;;  %v2012_v62 = vmul.f32 %v2807_v52, %v3384_v35 }
 0x345   :  { %2056 = vadd.xlane.f32.xlu0 %v2055_v61  ;;  %v2058_v63 = vsel %vm262_vm1, %v2012_v62, 0.0 }
 0x346   :  { %v1166_v3 = vpop.xlane.xlu1 %1165 }
 0x347   :  { %v1188_v9 = vrot.slane %v1166_v3, 4  ;;  %2059 = vadd.xlane.f32.xlu1 %v2058_v63 }
 0x349   :  { %v1189_v4 = vmax.f32 %v1166_v3, %v1188_v9 }
 0x34b   :  { %v1190_v10 = vrot.slane %v1189_v4, 2 }
 0x34d   :  { %v1191_v12 = vmax.f32 %v1189_v4, %v1190_v10 }
 0x34e   :  { %v1169_v26 = vpop.xlane.xlu0 %1168 }
 0x34f   :  { %v1192_v58 = vrot.slane %v1191_v12, 1  ;;  %v1194_v60 = vrot.slane %v1169_v26, 4 }
 0x351   :  { %v1193_v24 = vmax.f32 %v1191_v12, %v1192_v58  ;;  %v1195_v23 = vmax.f32 %v1169_v26, %v1194_v60 }
 0x353   :  { %v1236_v25 = vsub.f32 %v1166_v3, %v1193_v24  ;;  %v1196_v1 = vrot.slane %v1195_v23, 2 }
 0x355   :  { %v1244_v2 = vmul.f32 1.442695, %v1236_v25  ;;  %v1197_v15 = vmax.f32 %v1195_v23, %v1196_v1 }
 0x356   :  { %v1175_v5 = vpop.xlane.xlu0 %1174 }
 0x357   :  { %2808 = vpow2.f32 %v1244_v2  ;;  %v1198_v35 = vrot.slane %v1197_v15, 1  ;;  %v1206_v7 = vrot.slane %v1175_v5, 4  ;;  %v1172_v8 = vpop.xlane.xlu1 %1171 }
 0x358   :  { %v1200_v11 = vrot.slane %v1172_v8, 4 }
 0x359   :  { %v1199_v13 = vmax.f32 %v1197_v15, %v1198_v35  ;;  %v1207_v14 = vmax.f32 %v1175_v5, %v1206_v7 }
 0x35a   :  { %v1201_v17 = vmax.f32 %v1172_v8, %v1200_v11 }
 0x35b   :  { %v1237_v18 = vsub.f32 %v1169_v26, %v1199_v13  ;;  %v1208_v16 = vrot.slane %v1207_v14, 2 }
 0x35c   :  { %v1202_v42 = vrot.slane %v1201_v17, 2 }
 0x35d   :  { %v1246_v19 = vmul.f32 1.442695, %v1237_v18  ;;  %v1209_v21 = vmax.f32 %v1207_v14, %v1208_v16 }
 0x35e   :  { %v1203_v22 = vmax.f32 %v1201_v17, %v1202_v42  ;;  %v1181_v27 = vpop.xlane.xlu1 %1180 }
 0x35f   :  { %2810 = vpow2.f32 %v1246_v19  ;;  %v1210_v28 = vrot.slane %v1209_v21, 1  ;;  %v1218_v29 = vrot.slane %v1181_v27, 4 }
 0x360   :  { %v1204_v30 = vrot.slane %v1203_v22, 1  ;;  %v1178_v31 = vpop.xlane.xlu0 %1177 }
 0x361   :  { %v3418_v32 = vpop.eup %2808  ;;  %v1211_v33 = vmax.f32 %v1209_v21, %v1210_v28  ;;  %v1219_v34 = vmax.f32 %v1181_v27, %v1218_v29  ;;  %v1212_v20 = vrot.slane %v1178_v31, 4 }
 0x362   :  { %v1260_v36 = vrot.slane %v3418_v32, 4  ;;  %v1205_v37 = vmax.f32 %v1203_v22, %v1204_v30 }
 0x363   :  { %v1239_v38 = vsub.f32 %v1175_v5, %v1211_v33  ;;  %v1220_v39 = vrot.slane %v1219_v34, 2  ;;  %v1213_v40 = vmax.f32 %v1178_v31, %v1212_v20 }
 0x364   :  { %v1261_v41 = vadd.f32 %v3418_v32, %v1260_v36  ;;  %v1238_v46 = vsub.f32 %v1172_v8, %v1205_v37 }
 0x365   :  { %v1250_v48 = vmul.f32 1.442695, %v1239_v38  ;;  %v1221_v49 = vmax.f32 %v1219_v34, %v1220_v39  ;;  %v1214_v53 = vrot.slane %v1213_v40, 2 }
 0x366   :  { %v1262_v54 = vrot.slane %v1261_v41, 2  ;;  %v1248_v6 = vmul.f32 1.442695, %v1238_v46  ;;  %v1187_v0 = vpop.xlane.xlu1 %1186 }
 0x367   :  { %2812 = vpow2.f32 %v1250_v48  ;;  %v1222_v56 = vrot.slane %v1221_v49, 1  ;;  %v1215_v57 = vmax.f32 %v1213_v40, %v1214_v53  ;;  %v1230_v51 = vrot.slane %v1187_v0, 4 }
 0x368   :  { %v1263_v44 = vadd.f32 %v1262_v54, %v1261_v41  ;;  %2814 = vpow2.f32 %v1248_v6  ;;  %v1184_v47 = vpop.xlane.xlu0 %1183 }
 0x369   :  { %v3422_v55 = vpop.eup %2810  ;;  %v1223_v43 = vmax.f32 %v1221_v49, %v1222_v56  ;;  %v1216_v45 = vrot.slane %v1215_v57, 1  ;;  %v1231_v50 = vmax.f32 %v1187_v0, %v1230_v51  ;;  %v1224_v52 = vrot.slane %v1184_v47, 4 }
 0x36a   :  { %v1266_v59 = vrot.slane %v3422_v55, 4  ;;  %v1264_v9 = vrot.slane %v1263_v44, 1 }
 0x36b   :  { %v1241_v61 = vsub.f32 %v1181_v27, %v1223_v43  ;;  %v1217_v62 = vmax.f32 %v1215_v57, %v1216_v45  ;;  %v1232_v63 = vrot.slane %v1231_v50, 2  ;;  %v1225_v3 = vmax.f32 %v1184_v47, %v1224_v52  ;;  %v2888_v43 = vld [vmem:[%s3671_s0 + $0x8] sm:$0xff] }
 0x36c   :  { %v1267_v4 = vadd.f32 %v3422_v55, %v1266_v59  ;;  %v1265_v15 = vadd.f32 %v1264_v9, %v1263_v44 }
 0x36d   :  { %v1254_v10 = vmul.f32 1.442695, %v1241_v61  ;;  %v1240_v12 = vsub.f32 %v1178_v31, %v1217_v62  ;;  %v1233_v26 = vmax.f32 %v1231_v50, %v1232_v63  ;;  %v1226_v58 = vrot.slane %v1225_v3, 2  ;;  %v2889_v62 = vld [vmem:[%s3671_s0] sm:$0xff] }
 0x36e   :  { %v1268_v60 = vrot.slane %v1267_v4, 2 }
 0x36f   :  { %2816 = vpow2.f32 %v1254_v10  ;;  %v1252_v24 = vmul.f32 1.442695, %v1240_v12  ;;  %v1234_v23 = vrot.slane %v1233_v26, 1  ;;  %v1227_v25 = vmax.f32 %v1225_v3, %v1226_v58 }
 0x370   :  { %v1269_v1 = vadd.f32 %v1268_v60, %v1267_v4 }
 0x371   :  { %v3426_v2 = vpop.eup %2812  ;;  %2818 = vpow2.f32 %v1252_v24  ;;  %v1235_v5 = vmax.f32 %v1233_v26, %v1234_v23  ;;  %v1228_v35 = vrot.slane %v1227_v25, 1 }
 0x372   :  { %v3428_v7 = vpop.eup %2814  ;;  %v1270_v8 = vrot.slane %v1269_v1, 1  ;;  %v1278_v11 = vrot.slane %v3426_v2, 4  ;;  %2820 = vrcp.f32 %v1265_v15 }
 0x373   :  { %v1272_v13 = vrot.slane %v3428_v7, 4  ;;  %v1243_v14 = vsub.f32 %v1187_v0, %v1235_v5  ;;  %v1229_v17 = vmax.f32 %v1227_v25, %v1228_v35  ;;  %v2890_v25 = vld [vmem:[%s3671_s0 + $0x18] sm:$0xff]  ;;  %v2891_v35 = vld [vmem:[%s3671_s0 + $0x10] sm:$0xff] }
 0x374   :  { %v1271_v18 = vadd.f32 %v1270_v8, %v1269_v1  ;;  %v1279_v16 = vadd.f32 %v3426_v2, %v1278_v11 }
 0x375   :  { %v1273_v42 = vadd.f32 %v3428_v7, %v1272_v13  ;;  %v1258_v19 = vmul.f32 1.442695, %v1243_v14  ;;  %v1242_v21 = vsub.f32 %v1184_v47, %v1229_v17 }
 0x376   :  { %2822 = vrcp.f32 %v1271_v18  ;;  %v1280_v22 = vrot.slane %v1279_v16, 2 }
 0x377   :  { %v1274_v27 = vrot.slane %v1273_v42, 2  ;;  %2824 = vpow2.f32 %v1258_v19  ;;  %v1256_v28 = vmul.f32 1.442695, %v1242_v21 }
 0x378   :  { %v1281_v29 = vadd.f32 %v1280_v22, %v1279_v16 }
 0x379   :  { %v3434_v30 = vpop.eup %2816  ;;  %v1275_v31 = vadd.f32 %v1274_v27, %v1273_v42  ;;  %2826 = vpow2.f32 %v1256_v28 }
 0x37a   :  { %v1282_v33 = vrot.slane %v1281_v29, 1  ;;  %v1290_v34 = vrot.slane %v3434_v30, 4 }
 0x37b   :  { %v3437_v20 = vpop.eup %2818  ;;  %v1276_v36 = vrot.slane %v1275_v31, 1 }
 0x37c   :  { %v1283_v37 = vadd.f32 %v1282_v33, %v1281_v29  ;;  %v1291_v38 = vadd.f32 %v3434_v30, %v1290_v34  ;;  %v1284_v39 = vrot.slane %v3437_v20, 4  ;;  %v2821_v48 = vpop.eup %2820  ;;  %v2892_v33 = vld [vmem:[%s3671_s0 + $0x28] sm:$0xff] }
 0x37d   :  { %v1277_v40 = vadd.f32 %v1276_v36, %v1275_v31  ;;  %v1309_v47 = vmul.f32 %v2821_v48, %v3418_v32 }
 0x37e   :  { %2828 = vrcp.f32 %v1283_v37  ;;  %v1292_v41 = vrot.slane %v1291_v38, 2  ;;  %v1285_v46 = vadd.f32 %v3437_v20, %v1284_v39  ;;  %v2893_v39 = vld [vmem:[%s3671_s0 + $0x20] sm:$0xff] }
 0x37f   :  { %2830 = vrcp.f32 %v1277_v40  ;;  %v1324_v63 = vmul.f32 %v2889_v62, %v1309_v47 }
 0x380   :  { %v2823_v49 = vpop.eup %2822  ;;  %v1293_v53 = vadd.f32 %v1292_v41, %v1291_v38  ;;  %v1286_v54 = vrot.slane %v1285_v46, 2 }
 0x381   :  { %v3442_v6 = vpop.eup %2824  ;;  %v1311_v0 = vmul.f32 %v2823_v49, %v3422_v55  ;;  %v1332_v23 = vsel %vm262_vm1, %v1324_v63, 0.0 }
 0x382   :  { %v1294_v56 = vrot.slane %v1293_v53, 1  ;;  %v1287_v57 = vadd.f32 %v1286_v54, %v1285_v46  ;;  %v1302_v51 = vrot.slane %v3442_v6, 4  ;;  %v1333_v14 = vrot.slane %v1332_v23, 4 }
 0x383   :  { %v3446_v44 = vpop.eup %2826  ;;  %v1325_v45 = vmul.f32 %v2888_v43, %v1311_v0 }
 0x384   :  { %v1295_v50 = vadd.f32 %v1294_v56, %v1293_v53  ;;  %v1288_v52 = vrot.slane %v1287_v57, 1  ;;  %v1303_v59 = vadd.f32 %v3442_v6, %v1302_v51  ;;  %v1296_v61 = vrot.slane %v3446_v44, 4 }
 0x385   :  { %v1339_v32 = vsel %vm262_vm1, %v1325_v45, 0.0  ;;  %v1334_v28 = vadd.f32 %v1333_v14, %v1332_v23 }
 0x386   :  { %2832 = vrcp.f32 %v1295_v50  ;;  %v1289_v55 = vadd.f32 %v1288_v52, %v1287_v57  ;;  %v1304_v3 = vrot.slane %v1303_v59, 2  ;;  %v1297_v9 = vadd.f32 %v3446_v44, %v1296_v61 }
 0x387   :  { %v1340_v60 = vrot.slane %v1339_v32, 4  ;;  %v1335_v40 = vrot.slane %v1334_v28, 2 }
 0x388   :  { %v2829_v4 = vpop.eup %2828  ;;  %2834 = vrcp.f32 %v1289_v55  ;;  %v1305_v26 = vadd.f32 %v1304_v3, %v1303_v59  ;;  %v1298_v58 = vrot.slane %v1297_v9, 2  ;;  %v2894_v59 = vld [vmem:[%s3671_s0 + $0x38] sm:$0xff] }
 0x389   :  { %v2831_v10 = vpop.eup %2830  ;;  %v1315_v12 = vmul.f32 %v2829_v4, %v3426_v2  ;;  %v1336_v57 = vadd.f32 %v1335_v40, %v1334_v28 }
 0x38a   :  { %v1313_v24 = vmul.f32 %v2831_v10, %v3428_v7  ;;  %v1306_v15 = vrot.slane %v1305_v26, 1  ;;  %v1299_v5 = vadd.f32 %v1298_v58, %v1297_v9  ;;  %v1341_v7 = vadd.f32 %v1340_v60, %v1339_v32 }
 0x38b   :  { %v1327_v1 = vmul.f32 %v2890_v25, %v1315_v12  ;;  %v1337_v63 = vrot.slane %v1336_v57, 1 }
 0x38c   :  { %v1326_v8 = vmul.f32 %v2891_v35, %v1313_v24  ;;  %v1307_v11 = vadd.f32 %v1306_v15, %v1305_v26  ;;  %v1300_v13 = vrot.slane %v1299_v5, 1  ;;  %v1342_v29 = vrot.slane %v1341_v7, 2 }
 0x38d   :  { %v1353_v2 = vsel %vm262_vm1, %v1327_v1, 0.0  ;;  %v1338_v25 = vadd.f32 %v1337_v63, %v1336_v57 }
 0x38e   :  { %v1346_v17 = vsel %vm262_vm1, %v1326_v8, 0.0  ;;  %v1354_v18 = vrot.slane %v1353_v2, 4  ;;  %2836 = vrcp.f32 %v1307_v11  ;;  %v1301_v42 = vadd.f32 %v1300_v13, %v1299_v5 }
 0x38f   :  { %v1347_v16 = vrot.slane %v1346_v17, 4  ;;  %v1343_v46 = vadd.f32 %v1342_v29, %v1341_v7 }
 0x390   :  { %v2833_v19 = vpop.eup %2832  ;;  %2838 = vrcp.f32 %v1301_v42  ;;  %v1355_v31 = vadd.f32 %v1354_v18, %v1353_v2 }
 0x391   :  { %v1348_v21 = vadd.f32 %v1347_v16, %v1346_v17  ;;  %v1319_v22 = vmul.f32 %v2833_v19, %v3434_v30  ;;  %v1344_v43 = vrot.slane %v1343_v46, 1 }
 0x392   :  { %v2835_v27 = vpop.eup %2834  ;;  %v1356_v48 = vrot.slane %v1355_v31, 2 }
 0x393   :  { %v1329_v34 = vmul.f32 %v2892_v33, %v1319_v22  ;;  %v1317_v36 = vmul.f32 %v2835_v27, %v3437_v20  ;;  %v1349_v37 = vrot.slane %v1348_v21, 2  ;;  %v1345_v58 = vadd.f32 %v1344_v43, %v1343_v46 }
 0x394   :  { %v1357_v45 = vadd.f32 %v1356_v48, %v1355_v31 }
 0x395   :  { %v1367_v38 = vsel %vm262_vm1, %v1329_v34, 0.0  ;;  %v1328_v30 = vmul.f32 %v2893_v39, %v1317_v36  ;;  %v1350_v56 = vadd.f32 %v1349_v37, %v1348_v21  ;;  %v2342_v35 = vsel %vm2341_vm6, %v1345_v58, %v1338_v25 }
 0x396   :  { %v1368_v41 = vrot.slane %v1367_v38, 4  ;;  %v1358_v10 = vrot.slane %v1357_v45, 1 }
 0x397   :  { %v1360_v49 = vsel %vm262_vm1, %v1328_v30, 0.0  ;;  %v1351_v62 = vrot.slane %v1350_v56, 1 }
 0x398   :  { %v1369_v53 = vadd.f32 %v1368_v41, %v1367_v38  ;;  %v1361_v54 = vrot.slane %v1360_v49, 4  ;;  %v2837_v0 = vpop.eup %2836  ;;  %v1359_v8 = vadd.f32 %v1358_v10, %v1357_v45 }
 0x399   :  { %v1323_v51 = vmul.f32 %v2837_v0, %v3442_v6  ;;  %v2895_v6 = vld [vmem:[%s3671_s0 + $0x30] sm:$0xff]  ;;  %v1352_v23 = vadd.f32 %v1351_v62, %v1350_v56 }
 0x39a   :  { %v1362_v20 = vadd.f32 %v1361_v54, %v1360_v49  ;;  %v2839_v47 = vpop.eup %2838  ;;  %v1370_v50 = vrot.slane %v1369_v53, 2 }
 0x39b   :  { %v1331_v61 = vmul.f32 %v2894_v59, %v1323_v51  ;;  %v1321_v55 = vmul.f32 %v2839_v47, %v3446_v44  ;;  %v2344_v13 = vsel %vm2343_vm7, %v1352_v23, %v2342_v35 }
 0x39c   :  { %v1363_v52 = vrot.slane %v1362_v20, 2  ;;  %v1371_v12 = vadd.f32 %v1370_v50, %v1369_v53  ;;  %v2346_v18 = vsel %vm2345_vm8, %v1359_v8, %v2344_v13 }
 0x39d   :  { %v1381_v3 = vsel %vm262_vm1, %v1331_v61, 0.0  ;;  %v1330_v9 = vmul.f32 %v2895_v6, %v1321_v55 }
 0x39e   :  { %v1364_v32 = vadd.f32 %v1363_v52, %v1362_v20  ;;  %v1382_v4 = vrot.slane %v1381_v3, 4  ;;  %v1372_v5 = vrot.slane %v1371_v12, 1 }
 0x39f   :  { %v1374_v26 = vsel %vm262_vm1, %v1330_v9, 0.0 }
 0x3a0   :  { %v1365_v60 = vrot.slane %v1364_v32, 1  ;;  %v1383_v24 = vadd.f32 %v1382_v4, %v1381_v3  ;;  %v1375_v44 = vrot.slane %v1374_v26, 4  ;;  %v1373_v16 = vadd.f32 %v1372_v5, %v1371_v12 }
 0x3a2   :  { %v1384_v1 = vrot.slane %v1383_v24, 2  ;;  %v1376_v15 = vadd.f32 %v1375_v44, %v1374_v26  ;;  %v1366_v14 = vadd.f32 %v1365_v60, %v1364_v32 }
 0x3a4   :  { %v1385_v2 = vadd.f32 %v1384_v1, %v1383_v24  ;;  %v1377_v11 = vrot.slane %v1376_v15, 2  ;;  %v2348_v19 = vsel %vm2347_vm9, %v1366_v14, %v2346_v18 }
 0x3a5   :  { %v2350_v27 = vsel %vm2349_vm10, %v1373_v16, %v2348_v19 }
 0x3a6   :  { %v1386_v7 = vrot.slane %v1385_v2, 1  ;;  %v1378_v17 = vadd.f32 %v1377_v11, %v1376_v15 }
 0x3a8   :  { %v1379_v42 = vrot.slane %v1378_v17, 1  ;;  %v1387_v21 = vadd.f32 %v1386_v7, %v1385_v2 }
 0x3aa   :  { %v1380_v22 = vadd.f32 %v1379_v42, %v1378_v17 }
 0x3ac   :  { %v2352_v28 = vsel %vm2351_vm11, %v1380_v22, %v2350_v27 }
 0x3ad   :  { %v2354_v29 = vsel %vm2353_vm12, %v1387_v21, %v2352_v28  ;;  %v2015_v31 = vpop.xlane.xlu0 %2014 }
 0x3ae   :  { %v2372_v34 = vsel %vm262_vm1, %v2354_v29, 0.0 }
 0x3af   :  { %v2018_v33 = vpop.xlane.xlu1 %2017  ;;  %2374 = vst [vmem:[%s3674_s6] sm:$0xff] %v2372_v34 }
 0x3b0   :  { %v2061_v36 = vmax.f32 %v2015_v31, %v2018_v33 }
 0x3b2   :  { %v2062_v37 = vrot.slane %v2061_v36, 4 }
 0x3b4   :  { %v2063_v38 = vmax.f32 %v2061_v36, %v2062_v37 }
 0x3b5   :  { %v2021_v30 = vpop.xlane.xlu0 %2020 }
 0x3b6   :  { %v2064_v39 = vrot.slane %v2063_v38, 2 }
 0x3b7   :  { %v2024_v40 = vpop.xlane.xlu1 %2023 }
 0x3b8   :  { %v2065_v41 = vmax.f32 %v2063_v38, %v2064_v39  ;;  %v2068_v46 = vmax.f32 %v2021_v30, %v2024_v40 }
 0x3ba   :  { %v2066_v48 = vrot.slane %v2065_v41, 1  ;;  %v2069_v49 = vrot.slane %v2068_v46, 4 }
 0x3bc   :  { %v2067_v53 = vmax.f32 %v2065_v41, %v2066_v48  ;;  %v2070_v54 = vmax.f32 %v2068_v46, %v2069_v49 }
 0x3bd   :  { %v2027_v0 = vpop.xlane.xlu0 %2026 }
 0x3be   :  { %v2117_v56 = vsub.f32 %v2015_v31, %v2067_v53  ;;  %v2118_v57 = vsub.f32 %v2018_v33, %v2067_v53  ;;  %v2071_v20 = vrot.slane %v2070_v54, 2 }
 0x3bf   :  { %v2030_v51 = vpop.xlane.xlu1 %2029 }
 0x3c0   :  { %v2133_v47 = vmul.f32 1.442695, %v2117_v56  ;;  %v2135_v43 = vmul.f32 1.442695, %v2118_v57  ;;  %v2072_v45 = vmax.f32 %v2070_v54, %v2071_v20  ;;  %v2075_v50 = vmax.f32 %v2027_v0, %v2030_v51 }
 0x3c1   :  { %v2033_v52 = vpop.xlane.xlu0 %2032 }
 0x3c2   :  { %2840 = vpow2.f32 %v2133_v47  ;;  %v2073_v59 = vrot.slane %v2072_v45, 1  ;;  %v2076_v61 = vrot.slane %v2075_v50, 4 }
 0x3c3   :  { %2842 = vpow2.f32 %v2135_v43  ;;  %v2036_v55 = vpop.xlane.xlu1 %2035 }
 0x3c4   :  { %v2074_v62 = vmax.f32 %v2072_v45, %v2073_v59  ;;  %v2077_v63 = vmax.f32 %v2075_v50, %v2076_v61  ;;  %v2082_v32 = vmax.f32 %v2033_v52, %v2036_v55 }
 0x3c6   :  { %v2119_v3 = vsub.f32 %v2021_v30, %v2074_v62  ;;  %v2120_v6 = vsub.f32 %v2024_v40, %v2074_v62  ;;  %v2078_v9 = vrot.slane %v2077_v63, 2  ;;  %v2083_v4 = vrot.slane %v2082_v32, 4  ;;  %v3501_v10 = vpop.xlane.xlu0 %2038 }
 0x3c8   :  { %v2137_v12 = vmul.f32 1.442695, %v2119_v3  ;;  %v2139_v26 = vmul.f32 1.442695, %v2120_v6  ;;  %v2079_v58 = vmax.f32 %v2077_v63, %v2078_v9  ;;  %v2084_v60 = vmax.f32 %v2082_v32, %v2083_v4  ;;  %v2042_v24 = vpop.xlane.xlu1 %2041 }
 0x3c9   :  { %v2089_v44 = vmax.f32 %v3501_v10, %v2042_v24 }
 0x3ca   :  { %2844 = vpow2.f32 %v2137_v12  ;;  %v2080_v23 = vrot.slane %v2079_v58, 1  ;;  %v2085_v25 = vrot.slane %v2084_v60, 2  ;;  %v3504_v1 = vpop.xlane.xlu0 %2044 }
 0x3cb   :  { %2846 = vpow2.f32 %v2139_v26  ;;  %v2090_v15 = vrot.slane %v2089_v44, 4 }
 0x3cc   :  { %v3506_v5 = vpop.eup %2840  ;;  %v2081_v35 = vmax.f32 %v2079_v58, %v2080_v23  ;;  %v2086_v8 = vmax.f32 %v2084_v60, %v2085_v25  ;;  %v3508_v2 = vpop.xlane.xlu1 %2047 }
 0x3cd   :  { %v3510_v11 = vpop.eup %2842  ;;  %v2091_v13 = vmax.f32 %v2089_v44, %v2090_v15  ;;  %v2096_v14 = vmax.f32 %v3504_v1, %v3508_v2 }
 0x3ce   :  { %v2165_v7 = vadd.f32 %v3510_v11, %v3506_v5  ;;  %v2121_v17 = vsub.f32 %v2027_v0, %v2081_v35  ;;  %v2122_v18 = vsub.f32 %v2030_v51, %v2081_v35  ;;  %v2087_v16 = vrot.slane %v2086_v8, 1  ;;  %v3516_v42 = vpop.xlane.xlu0 %2050 }
 0x3cf   :  { %v2092_v19 = vrot.slane %v2091_v13, 2  ;;  %v2097_v21 = vrot.slane %v2096_v14, 4 }
 0x3d0   :  { %v2166_v22 = vrot.slane %v2165_v7, 4  ;;  %v2141_v27 = vmul.f32 1.442695, %v2121_v17  ;;  %v2143_v28 = vmul.f32 1.442695, %v2122_v18  ;;  %v2088_v29 = vmax.f32 %v2086_v8, %v2087_v16  ;;  %v3518_v31 = vpop.xlane.xlu1 %2053 }
 0x3d1   :  { %v2093_v33 = vmax.f32 %v2091_v13, %v2092_v19  ;;  %v2098_v34 = vmax.f32 %v2096_v14, %v2097_v21  ;;  %v2103_v36 = vmax.f32 %v3516_v42, %v3518_v31 }
 0x3d2   :  { %v2167_v37 = vadd.f32 %v2166_v22, %v2165_v7  ;;  %2848 = vpow2.f32 %v2141_v27  ;;  %v2123_v38 = vsub.f32 %v2033_v52, %v2088_v29  ;;  %v2124_v39 = vsub.f32 %v2036_v55, %v2088_v29  ;;  %v3524_v53 = vpop.xlane.xlu0 %2056 }
 0x3d3   :  { %2850 = vpow2.f32 %v2143_v28  ;;  %v2094_v30 = vrot.slane %v2093_v33, 1  ;;  %v2099_v40 = vrot.slane %v2098_v34, 2  ;;  %v2104_v41 = vrot.slane %v2103_v36, 4 }
 0x3d4   :  { %v3522_v46 = vpop.eup %2844  ;;  %v2145_v48 = vmul.f32 1.442695, %v2123_v38  ;;  %v2147_v49 = vmul.f32 1.442695, %v2124_v39  ;;  %v3526_v54 = vpop.xlane.xlu1 %2059  ;;  %v2168_v47 = vrot.slane %v2167_v37, 2 }
 0x3d5   :  { %v3528_v0 = vpop.eup %2846  ;;  %v2095_v56 = vmax.f32 %v2093_v33, %v2094_v30  ;;  %v2100_v57 = vmax.f32 %v2098_v34, %v2099_v40  ;;  %v2105_v20 = vmax.f32 %v2103_v36, %v2104_v41  ;;  %v2110_v51 = vmax.f32 %v3524_v53, %v3526_v54 }
 0x3d6   :  { %v2172_v43 = vadd.f32 %v3528_v0, %v3522_v46  ;;  %2852 = vpow2.f32 %v2145_v48  ;;  %v2169_v4 = vadd.f32 %v2168_v47, %v2167_v37 }
 0x3d7   :  { %2854 = vpow2.f32 %v2147_v49  ;;  %v2125_v45 = vsub.f32 %v3501_v10, %v2095_v56  ;;  %v2126_v50 = vsub.f32 %v2042_v24, %v2095_v56  ;;  %v2101_v52 = vrot.slane %v2100_v57, 1 }
 0x3d8   :  { %v2173_v59 = vrot.slane %v2172_v43, 4  ;;  %v2106_v61 = vrot.slane %v2105_v20, 2  ;;  %v2111_v55 = vrot.slane %v2110_v51, 4  ;;  %v2170_v14 = vrot.slane %v2169_v4, 1 }
 0x3d9   :  { %v2149_v62 = vmul.f32 1.442695, %v2125_v45  ;;  %v2151_v63 = vmul.f32 1.442695, %v2126_v50  ;;  %v2102_v32 = vmax.f32 %v2100_v57, %v2101_v52 }
 0x3da   :  { %v2174_v3 = vadd.f32 %v2173_v59, %v2172_v43  ;;  %v2107_v6 = vmax.f32 %v2105_v20, %v2106_v61  ;;  %v2112_v9 = vmax.f32 %v2110_v51, %v2111_v55  ;;  %v2171_v28 = vadd.f32 %v2170_v14, %v2169_v4 }
 0x3db   :  { %2856 = vpow2.f32 %v2149_v62  ;;  %v2127_v12 = vsub.f32 %v3504_v1, %v2102_v32  ;;  %v2128_v26 = vsub.f32 %v3508_v2, %v2102_v32 }
 0x3dc   :  { %v3537_v58 = vpop.eup %2848  ;;  %v2175_v10 = vrot.slane %v2174_v3, 2  ;;  %v2108_v60 = vrot.slane %v2107_v6, 1  ;;  %v2113_v24 = vrot.slane %v2112_v9, 2  ;;  %2858 = vpow2.f32 %v2151_v63 }
 0x3dd   :  { %v3539_v44 = vpop.eup %2850  ;;  %v2153_v23 = vmul.f32 1.442695, %v2127_v12  ;;  %v2155_v25 = vmul.f32 1.442695, %v2128_v26 }
 0x3de   :  { %v2176_v15 = vadd.f32 %v2175_v10, %v2174_v3  ;;  %v2179_v35 = vadd.f32 %v3539_v44, %v3537_v58  ;;  %v2109_v8 = vmax.f32 %v2107_v6, %v2108_v60  ;;  %v2114_v13 = vmax.f32 %v2112_v9, %v2113_v24 }
 0x3df   :  { %2860 = vpow2.f32 %v2153_v23 }
 0x3e0   :  { %v3543_v1 = vpop.eup %2852  ;;  %v2177_v2 = vrot.slane %v2176_v15, 1  ;;  %v2180_v7 = vrot.slane %v2179_v35, 4  ;;  %2862 = vpow2.f32 %v2155_v25  ;;  %v2129_v17 = vsub.f32 %v3516_v42, %v2109_v8 }
 0x3e1   :  { %v3546_v18 = vpop.eup %2854  ;;  %v2130_v16 = vsub.f32 %v3518_v31, %v2109_v8  ;;  %v2115_v19 = vrot.slane %v2114_v13, 1 }
 0x3e2   :  { %v2181_v21 = vadd.f32 %v2180_v7, %v2179_v35  ;;  %v2186_v22 = vadd.f32 %v3546_v18, %v3543_v1  ;;  %v2157_v27 = vmul.f32 1.442695, %v2129_v17  ;;  %v2178_v34 = vadd.f32 %v2177_v2, %v2176_v15 }
 0x3e3   :  { %v2159_v29 = vmul.f32 1.442695, %v2130_v16  ;;  %v2116_v33 = vmax.f32 %v2114_v13, %v2115_v19 }
 0x3e4   :  { %v2182_v36 = vrot.slane %v2181_v21, 2  ;;  %v2187_v37 = vrot.slane %v2186_v22, 4  ;;  %2864 = vpow2.f32 %v2157_v27 }
 0x3e5   :  { %v3551_v38 = vpop.eup %2856  ;;  %v2131_v42 = vsub.f32 %v3524_v53, %v2116_v33  ;;  %v2132_v39 = vsub.f32 %v3526_v54, %v2116_v33  ;;  %2866 = vpow2.f32 %v2159_v29  ;;  %v2899_v33 = vld [vmem:[%s3669_s1 + $0x18] sm:$0xff] }
 0x3e6   :  { %v2183_v31 = vadd.f32 %v2182_v36, %v2181_v21  ;;  %v2188_v30 = vadd.f32 %v2187_v37, %v2186_v22  ;;  %v3555_v40 = vpop.eup %2858  ;;  %2868 = vrcp.f32 %v2171_v28 }
 0x3e7   :  { %v2161_v41 = vmul.f32 1.442695, %v2131_v42  ;;  %v2163_v48 = vmul.f32 1.442695, %v2132_v39  ;;  %2870 = vrcp.f32 %v2178_v34  ;;  %v2193_v57 = vadd.f32 %v3555_v40, %v3551_v38  ;;  %v2900_v42 = vld [vmem:[%s3669_s1 + $0x20] sm:$0xff] }
 0x3e8   :  { %v2184_v49 = vrot.slane %v2183_v31, 1  ;;  %v2189_v56 = vrot.slane %v2188_v30, 2 }
 0x3e9   :  { %v3559_v20 = vpop.eup %2860  ;;  %2872 = vpow2.f32 %v2161_v41  ;;  %v2194_v47 = vrot.slane %v2193_v57, 4 }
 0x3ea   :  { %v3561_v53 = vpop.eup %2862  ;;  %v2185_v54 = vadd.f32 %v2184_v49, %v2183_v31  ;;  %v2190_v51 = vadd.f32 %v2189_v56, %v2188_v30  ;;  %2874 = vpow2.f32 %v2163_v48  ;;  %v2901_v31 = vld [vmem:[%s3669_s1 + $0x28] sm:$0xff]  ;;  %v2902_v49 = vld [vmem:[%s3669_s1 + $0x30] sm:$0xff] }
 0x3eb   :  { %v2200_v43 = vadd.f32 %v3561_v53, %v3559_v20  ;;  %v2195_v50 = vadd.f32 %v2194_v47, %v2193_v57 }
 0x3ec   :  { %2876 = vrcp.f32 %v2185_v54  ;;  %v2191_v45 = vrot.slane %v2190_v51, 1 }
 0x3ed   :  { %v2201_v52 = vrot.slane %v2200_v43, 4  ;;  %v2196_v61 = vrot.slane %v2195_v50, 2 }
 0x3ee   :  { %v2192_v59 = vadd.f32 %v2191_v45, %v2190_v51  ;;  %v3565_v55 = vpop.eup %2864 }
 0x3ef   :  { %v2202_v62 = vadd.f32 %v2201_v52, %v2200_v43  ;;  %v3567_v63 = vpop.eup %2866  ;;  %v2197_v32 = vadd.f32 %v2196_v61, %v2195_v50 }
 0x3f0   :  { %2878 = vrcp.f32 %v2192_v59  ;;  %v2869_v3 = vpop.eup %2868  ;;  %v2207_v9 = vadd.f32 %v3567_v63, %v3565_v55 }
 0x3f1   :  { %v2203_v6 = vrot.slane %v2202_v62, 2  ;;  %v2871_v4 = vpop.eup %2870  ;;  %v2198_v12 = vrot.slane %v2197_v32, 1  ;;  %v2222_v13 = vmul.f32 %v2869_v3, %v3506_v5  ;;  %v2223_v14 = vmul.f32 %v2869_v3, %v3510_v11  ;;  %v2896_v5 = vld [vmem:[%s3669_s1] sm:$0xff] }
 0x3f2   :  { %v2208_v60 = vrot.slane %v2207_v9, 4  ;;  %v2225_v2 = vmul.f32 %v2871_v4, %v3522_v46  ;;  %v2226_v7 = vmul.f32 %v2871_v4, %v3528_v0  ;;  %v2897_v46 = vld [vmem:[%s3669_s1 + $0x8] sm:$0xff] }
 0x3f3   :  { %v3571_v26 = vpop.eup %2872  ;;  %v2204_v10 = vadd.f32 %v2203_v6, %v2202_v62  ;;  %v2199_v23 = vadd.f32 %v2198_v12, %v2197_v32  ;;  %v2245_v11 = vmul.f32 %v2896_v5, %v2222_v13  ;;  %v2246_v0 = vmul.f32 %v2897_v46, %v2223_v14 }
 0x3f4   :  { %v3573_v24 = vpop.eup %2874  ;;  %v2209_v15 = vadd.f32 %v2208_v60, %v2207_v9  ;;  %v2248_v34 = vmul.f32 %v2899_v33, %v2226_v7 }
 0x3f5   :  { %v2205_v25 = vrot.slane %v2204_v10, 1  ;;  %v2214_v35 = vadd.f32 %v3573_v24, %v3571_v26  ;;  %2880 = vrcp.f32 %v2199_v23  ;;  %v2261_v51 = vsel %vm96_vm0, %v2245_v11, 0.0  ;;  %v2905_v23 = vld [vmem:[%s3669_s1 + $0x48] sm:$0xff] }
 0x3f6   :  { %v2877_v8 = vpop.eup %2876  ;;  %v2210_v16 = vrot.slane %v2209_v15, 2  ;;  %v2262_v47 = vsel %vm96_vm0, %v2246_v0, 0.0  ;;  %v2271_v45 = vsel %vm96_vm0, %v2248_v34, 0.0 }
 0x3f7   :  { %v2206_v17 = vadd.f32 %v2205_v25, %v2204_v10  ;;  %v2228_v19 = vmul.f32 %v2877_v8, %v3537_v58  ;;  %v2229_v21 = vmul.f32 %v2877_v8, %v3539_v44  ;;  %v2215_v22 = vrot.slane %v2214_v35, 4  ;;  %v2898_v58 = vld [vmem:[%s3669_s1 + $0x10] sm:$0xff]  ;;  %v2904_v10 = vld [vmem:[%s3669_s1 + $0x40] sm:$0xff] }
 0x3f8   :  { %v2211_v27 = vadd.f32 %v2210_v16, %v2209_v15  ;;  %v2247_v44 = vmul.f32 %v2898_v58, %v2225_v2 }
 0x3f9   :  { %2882 = vrcp.f32 %v2206_v17  ;;  %v2216_v29 = vadd.f32 %v2215_v22, %v2214_v35  ;;  %v2249_v39 = vmul.f32 %v2900_v42, %v2228_v19  ;;  %v2250_v30 = vmul.f32 %v2901_v31, %v2229_v21  ;;  %v2906_v17 = vld [vmem:[%s3669_s1 + $0x50] sm:$0xff]  ;;  %v2907_v21 = vld [vmem:[%s3669_s1 + $0x58] sm:$0xff]  ;;  %v2908_v42 = vld [vmem:[%s3669_s1 + $0x60] sm:$0xff] }
 0x3fa   :  { %v2879_v28 = vpop.eup %2878  ;;  %v2212_v41 = vrot.slane %v2211_v27, 1  ;;  %v2270_v43 = vsel %vm96_vm0, %v2247_v44, 0.0  ;;  %v2263_v35 = vadd.f32 %v2262_v47, %v2261_v51  ;;  %v2909_v31 = vld [vmem:[%s3669_s1 + $0x68] sm:$0xff] }
 0x3fb   :  { %v2231_v36 = vmul.f32 %v2879_v28, %v3543_v1  ;;  %v2232_v37 = vmul.f32 %v2879_v28, %v3546_v18  ;;  %v2217_v48 = vrot.slane %v2216_v29, 2  ;;  %v2903_v1 = vld [vmem:[%s3669_s1 + $0x38] sm:$0xff]  ;;  %v2279_v52 = vsel %vm96_vm0, %v2249_v39, 0.0 }
 0x3fc   :  { %v2213_v57 = vadd.f32 %v2212_v41, %v2211_v27  ;;  %v2280_v59 = vsel %vm96_vm0, %v2250_v30, 0.0  ;;  %v2272_v9 = vadd.f32 %v2271_v45, %v2270_v43  ;;  %v2264_v22 = vrot.slane %v2263_v35, 4 }
 0x3fd   :  { %v2251_v56 = vmul.f32 %v2902_v49, %v2231_v36  ;;  %v2252_v18 = vmul.f32 %v2903_v1, %v2232_v37  ;;  %v2218_v54 = vadd.f32 %v2217_v48, %v2216_v29  ;;  %v2281_v12 = vadd.f32 %v2280_v59, %v2279_v52  ;;  %v2910_v52 = vld [vmem:[%s3669_s1 + $0x70] sm:$0xff] }
 0x3fe   :  { %2884 = vrcp.f32 %v2213_v57  ;;  %v2273_v2 = vrot.slane %v2272_v9, 4  ;;  %v2265_v33 = vadd.f32 %v2264_v22, %v2263_v35 }
 0x3ff   :  { %v2881_v50 = vpop.eup %2880  ;;  %v2288_v61 = vsel %vm96_vm0, %v2251_v56, 0.0  ;;  %v2289_v62 = vsel %vm96_vm0, %v2252_v18, 0.0  ;;  %v2219_v6 = vrot.slane %v2218_v54, 1  ;;  %v2282_v19 = vrot.slane %v2281_v12, 4 }
 0x400   :  { %v2234_v32 = vmul.f32 %v2881_v50, %v3551_v38  ;;  %v2235_v3 = vmul.f32 %v2881_v50, %v3555_v40  ;;  %v2290_v8 = vadd.f32 %v2289_v62, %v2288_v61  ;;  %v2274_v46 = vadd.f32 %v2273_v2, %v2272_v9  ;;  %v2911_v62 = vld [vmem:[%s3669_s1 + $0x78] sm:$0xff] }
 0x401   :  { %v2220_v15 = vadd.f32 %v2219_v6, %v2218_v54  ;;  %v2283_v29 = vadd.f32 %v2282_v19, %v2281_v12  ;;  %v2266_v1 = vrot.slane %v2265_v33, 2 }
 0x402   :  { %v2253_v60 = vmul.f32 %v2904_v10, %v2234_v32  ;;  %v2254_v25 = vmul.f32 %v2905_v23, %v2235_v3  ;;  %v2275_v41 = vrot.slane %v2274_v46, 2 }
 0x403   :  { %v2883_v4 = vpop.eup %2882  ;;  %2886 = vrcp.f32 %v2220_v15  ;;  %v2267_v3 = vadd.f32 %v2266_v1, %v2265_v33 }
 0x404   :  { %v2237_v38 = vmul.f32 %v2883_v4, %v3559_v20  ;;  %v2238_v40 = vmul.f32 %v2883_v4, %v3561_v53  ;;  %v2297_v13 = vsel %vm96_vm0, %v2253_v60, 0.0  ;;  %v2298_v14 = vsel %vm96_vm0, %v2254_v25, 0.0 }
 0x405   :  { %v2299_v7 = vadd.f32 %v2298_v14, %v2297_v13  ;;  %v2291_v53 = vrot.slane %v2290_v8, 4  ;;  %v2276_v43 = vadd.f32 %v2275_v41, %v2274_v46  ;;  %v2268_v15 = vrot.slane %v2267_v3, 1 }
 0x406   :  { %v2255_v16 = vmul.f32 %v2906_v17, %v2237_v38  ;;  %v2256_v20 = vmul.f32 %v2907_v21, %v2238_v40 }
 0x407   :  { %v2300_v28 = vrot.slane %v2299_v7, 4  ;;  %v2292_v34 = vadd.f32 %v2291_v53, %v2290_v8  ;;  %v2277_v12 = vrot.slane %v2276_v43, 1 }
 0x408   :  { %v2306_v27 = vsel %vm96_vm0, %v2255_v16, 0.0  ;;  %v2307_v5 = vsel %vm96_vm0, %v2256_v20, 0.0  ;;  %v2885_v11 = vpop.eup %2884  ;;  %v2269_v16 = vadd.f32 %v2268_v15, %v2267_v3 }
 0x409   :  { %v2308_v0 = vadd.f32 %v2307_v5, %v2306_v27  ;;  %v2240_v58 = vmul.f32 %v2885_v11, %v3565_v55  ;;  %v2241_v44 = vmul.f32 %v2885_v11, %v3567_v63  ;;  %v2301_v37 = vadd.f32 %v2300_v28, %v2299_v7 }
 0x40a   :  { %v2284_v55 = vrot.slane %v2283_v29, 2  ;;  %v2293_v18 = vrot.slane %v2292_v34, 2  ;;  %v2278_v13 = vadd.f32 %v2277_v12, %v2276_v43 }
 0x40b   :  { %v2309_v36 = vrot.slane %v2308_v0, 4  ;;  %v2257_v39 = vmul.f32 %v2908_v42, %v2240_v58  ;;  %v2258_v30 = vmul.f32 %v2909_v31, %v2241_v44  ;;  %v2302_v51 = vrot.slane %v2301_v37, 2 }
 0x40c   :  { %v2285_v61 = vadd.f32 %v2284_v55, %v2283_v29  ;;  %v2294_v6 = vadd.f32 %v2293_v18, %v2292_v34  ;;  %v2364_v22 = vsel %vm2341_vm6, %v2278_v13, %v2269_v16 }
 0x40d   :  { %v2310_v48 = vadd.f32 %v2309_v36, %v2308_v0  ;;  %v2887_v49 = vpop.eup %2886  ;;  %v2315_v63 = vsel %vm96_vm0, %v2257_v39, 0.0  ;;  %v2316_v56 = vsel %vm96_vm0, %v2258_v30, 0.0 }
 0x40e   :  { %v2317_v57 = vadd.f32 %v2316_v56, %v2315_v63  ;;  %v2243_v54 = vmul.f32 %v2887_v49, %v3571_v26  ;;  %v2244_v47 = vmul.f32 %v2887_v49, %v3573_v24  ;;  %v2303_v24 = vadd.f32 %v2302_v51, %v2301_v37 }
 0x40f   :  { %v2311_v45 = vrot.slane %v2310_v48, 2  ;;  %v2286_v25 = vrot.slane %v2285_v61, 1  ;;  %v2295_v35 = vrot.slane %v2294_v6, 1 }
 0x410   :  { %v2318_v50 = vrot.slane %v2317_v57, 4  ;;  %v2259_v59 = vmul.f32 %v2910_v52, %v2243_v54  ;;  %v2260_v32 = vmul.f32 %v2911_v62, %v2244_v47  ;;  %v2304_v40 = vrot.slane %v2303_v24, 1 }
 0x411   :  { %v2312_v10 = vadd.f32 %v2311_v45, %v2310_v48  ;;  %v2287_v7 = vadd.f32 %v2286_v25, %v2285_v61  ;;  %v2296_v19 = vadd.f32 %v2295_v35, %v2294_v6 }
 0x412   :  { %v2319_v26 = vadd.f32 %v2318_v50, %v2317_v57  ;;  %v2324_v9 = vsel %vm96_vm0, %v2259_v59, 0.0  ;;  %v2325_v4 = vsel %vm96_vm0, %v2260_v32, 0.0  ;;  %v2305_v20 = vadd.f32 %v2304_v40, %v2303_v24 }
 0x413   :  { %v2326_v23 = vadd.f32 %v2325_v4, %v2324_v9  ;;  %v2313_v14 = vrot.slane %v2312_v10, 1  ;;  %v2365_v28 = vsel %vm2343_vm7, %v2287_v7, %v2364_v22 }
 0x414   :  { %v2320_v60 = vrot.slane %v2319_v26, 2  ;;  %v2366_v11 = vsel %vm2345_vm8, %v2296_v19, %v2365_v28 }
 0x415   :  { %v2327_v38 = vrot.slane %v2326_v23, 4  ;;  %v2314_v53 = vadd.f32 %v2313_v14, %v2312_v10  ;;  %v2367_v0 = vsel %vm2347_vm9, %v2305_v20, %v2366_v11 }
 0x416   :  { %v2321_v8 = vadd.f32 %v2320_v60, %v2319_v26 }
 0x417   :  { %v2328_v2 = vadd.f32 %v2327_v38, %v2326_v23  ;;  %v2368_v29 = vsel %vm2349_vm10, %v2314_v53, %v2367_v0 }
 0x418   :  { %v2322_v17 = vrot.slane %v2321_v8, 1 }
 0x419   :  { %v2329_v21 = vrot.slane %v2328_v2, 2 }
 0x41a   :  { %v2323_v5 = vadd.f32 %v2322_v17, %v2321_v8 }
 0x41b   :  { %v2330_v27 = vadd.f32 %v2329_v21, %v2328_v2 }
 0x41c   :  { %v2369_v44 = vsel %vm2351_vm11, %v2323_v5, %v2368_v29 }
 0x41d   :  { %v2331_v46 = vrot.slane %v2330_v27, 1 }
 0x41f   :  { %v2332_v58 = vadd.f32 %v2331_v46, %v2330_v27 }
 0x421   :  { %v2370_v33 = vsel %vm2353_vm12, %v2332_v58, %v2369_v44 }
 0x422   :  { %v2373_v34 = vsel %vm96_vm0, %v2370_v33, 0.0 }
 0x423   :  { %2375 = vst [vmem:[%s3674_s6 + $0x8] sm:$0xff] %v2373_v34 }

</bundles_post_ra>
